<compile_context>
chip_gen: v5e
topology: v5e:2x2
jax: 0.10.0
libtpu: 0.0.40
codegen_flags: <defaults>
</compile_context>

<pallas_src>
import jax
import jax.numpy as jnp
import numpy as np
from jax import lax
from jax.experimental import pallas as pl
from jax.experimental.pallas import tpu as pltpu

LANE = 128


def _round_up(x, m):
    return (x + m - 1) // m * m


def _pad2d(x, rows, cols):
    r, c = x.shape
    return jnp.pad(x, ((0, rows - r), (0, cols - c)))


# ----------------------------------------------------------------------------
# Fused kernel: attention_h -> O_h/BN1/FFN/BN2  and  attention_p -> O_p/tanh
# ----------------------------------------------------------------------------
def _san_layer_kernel(hp_ref, e_ref, ST_ref, Tt_ref,
                      WhQKV_ref, WpE_ref, Wmisc_ref, W2_ref, bias_ref,
                      hout_ref, pout_ref):
    f32 = jnp.float32
    bf16 = jnp.bfloat16
    Dp = hout_ref.shape[1]
    Fp = W2_ref.shape[0]

    hp = hp_ref[...]                  # [N, 2*Dp]  = [ h | p ], lane-padded
    h = hp[:, :Dp]
    p = hp[:, Dp:]
    e = e_ref[...]                    # [M, Dp]
    S = ST_ref[0]                     # [M, N] bf16 src one-hot (exact 0/1)
    T = ST_ref[1]                     # [M, N] bf16 dst one-hot
    Tt = Tt_ref[...]                  # [N, M] bf16 dst one-hot, pre-transposed on host

    Wmisc = Wmisc_ref[...]            # [Dp, 3*Dp+Fp] = [ WO_h | WO_p | W1 | P_head ]
    WOh = Wmisc[:, :Dp]
    WOp = Wmisc[:, Dp:2 * Dp]
    W1 = Wmisc[:, 2 * Dp:2 * Dp + Fp]
    P_head = Wmisc[:, 2 * Dp + Fp:]   # per-head sum+broadcast blocks (HS @ HS^T)

    B = bias_ref[...]                 # [8, Fp]  packed biases / BN affine params
    bOh, bn1w, bn1b = B[0:1, :Dp], B[1:2, :Dp], B[2:3, :Dp]
    b1 = B[3:4, :]
    b2, bn2w, bn2b, bOp = B[4:5, :Dp], B[5:6, :Dp], B[6:7, :Dp], B[7:8, :Dp]

    def mha(Qh, Kh, Vh, E):
        # gather node projections onto edges: bf16 x bf16 MXU, f32 accumulate
        # (S/T are exact 0/1 in bf16; only Q/K/V values get bf16-rounded)
        K_src = jnp.dot(S, Kh.astype(bf16), preferred_element_type=f32)   # [M, Dp]
        Q_dst = jnp.dot(T, Qh.astype(bf16), preferred_element_type=f32)   # [M, Dp]
        V_src = jnp.dot(S, Vh.astype(bf16), preferred_element_type=f32)   # [M, Dp]
        # score = (K_src * Q_dst) / sqrt(dh) * E   (scale pre-folded into WK)
        score = K_src * Q_dst * E                                          # f32 VPU
        # per-head sum broadcast back across the head's lanes via P_head;
        # clip/exp are elementwise so they commute with the broadcast.
        s_full = jnp.dot(score, P_head, preferred_element_type=f32)
        ss_full = jnp.exp(jnp.clip(s_full, -5.0, 5.0))                     # [M, Dp]
        # scatter-add over incoming edges (Tt pre-transposed -> no XLU transpose)
        Vw = V_src * ss_full
        wV = jnp.dot(Tt, Vw.astype(bf16), preferred_element_type=f32)      # [N, Dp]
        z = jnp.dot(Tt, ss_full.astype(bf16), preferred_element_type=f32)  # [N, Dp]
        d = z + 1e-6
        r = pl.reciprocal(d, approx=True)
        r = r * (2.0 - d * r)          # one Newton step -> near-exact reciprocal
        # keep the order wV * r: wV is exactly zero in padded lanes
        return wV * r

    # ---- projections: one K=2*Dp deep / 3*Dp wide matmul for the h-path QKV,
    #      and two wide matmuls from one packed slab for p-path QKV + E's ----
    QKVh = jnp.dot(hp, WhQKV_ref[...], preferred_element_type=f32)         # [N, 3*Dp]
    WpE = WpE_ref[...]
    QKVp = jnp.dot(p, WpE[:, :3 * Dp], preferred_element_type=f32)         # [N, 3*Dp]
    Eboth = jnp.dot(e, WpE[:, 3 * Dp:], preferred_element_type=f32)        # [M, 2*Dp]

    # ---------------- attention_h (input = concat(h, p)) --------------------
    h_attn = mha(QKVh[:, :Dp], QKVh[:, Dp:2 * Dp], QKVh[:, 2 * Dp:], Eboth[:, :Dp])

    # ---------------- O_h + residual + BN1 + FFN + residual + BN2 -----------
    hh = jnp.dot(h_attn, WOh, preferred_element_type=f32) + bOh
    hh = h + hh
    mean1 = jnp.mean(hh, axis=0, keepdims=True)
    var1 = jnp.mean((hh - mean1) ** 2, axis=0, keepdims=True)
    hh = (hh - mean1) * lax.rsqrt(var1 + 1e-5) * bn1w + bn1b

    h2 = hh
    hh = jnp.dot(hh, W1, preferred_element_type=f32) + b1
    hh = jnp.maximum(hh, 0.0)
    hh = jnp.dot(hh, W2_ref[...], preferred_element_type=f32) + b2
    hh = h2 + hh
    mean2 = jnp.mean(hh, axis=0, keepdims=True)
    var2 = jnp.mean((hh - mean2) ** 2, axis=0, keepdims=True)
    hout_ref[...] = (hh - mean2) * lax.rsqrt(var2 + 1e-5) * bn2w + bn2b

    # ---------------- attention_p + O_p + tanh + residual -------------------
    # TODO(synk): the reference applies .view() to attention_p's (out, score)
    # tuple; the only consistent semantics is using the node output (done here).
    p_attn = mha(QKVp[:, :Dp], QKVp[:, Dp:2 * Dp], QKVp[:, 2 * Dp:], Eboth[:, Dp:])
    pp = jnp.dot(p_attn, WOp, preferred_element_type=f32) + bOp
    pout_ref[...] = p + jnp.tanh(pp)


# ----------------------------------------------------------------------------
# Host wrapper: pack / prescale / pad params into slabs, run the kernel once.
# ----------------------------------------------------------------------------
def san_gt_lspe_forward(params, h, p, e, src, dst, num_heads):
    N, D = h.shape
    M = e.shape[0]
    dh = D // num_heads
    inv_scale = 1.0 / float(np.sqrt(dh))   # scaling('score', sqrt(out_dim)), out_dim=D//H
    Dp = _round_up(D, LANE)
    Fp = _round_up(2 * D, LANE)
    f32 = jnp.float32
    bf16 = jnp.bfloat16

    # node features: concat(h, p) once at padded lane width -> one [N, 2*Dp] operand
    hp = jnp.zeros((N, 2 * Dp), f32)
    hp = hp.at[:, :D].set(h).at[:, Dp:Dp + D].set(p)
    e_p = _pad2d(e, M, Dp)

    # bf16 one-hot gather/scatter matrices (0/1 exact), packed; Tt pre-transposed
    S = jax.nn.one_hot(src, N, dtype=bf16)          # [M, N]
    T = jax.nn.one_hot(dst, N, dtype=bf16)          # [M, N]
    ST = jnp.stack([S, T], axis=0)                  # [2, M, N]
    Tt = jnp.transpose(T)                           # [N, M]

    # --- packed weight slabs (static 128-lane-aligned slices in-kernel) ---
    # h-attention QKV over concat(h,p): one [2*Dp, 3*Dp] slab, K pre-scaled
    WhQKV = jnp.zeros((2 * Dp, 3 * Dp), f32)
    for col, (w, scl) in enumerate([(params["h_WQ"], 1.0),
                                    (params["h_WK"], inv_scale),
                                    (params["h_WV"], 1.0)]):
        WhQKV = WhQKV.at[:D, col * Dp:col * Dp + D].set(w[:D] * scl)
        WhQKV = WhQKV.at[Dp:Dp + D, col * Dp:col * Dp + D].set(w[D:] * scl)

    # p-attention QKV + both edge projections: one [Dp, 5*Dp] slab
    WpE = jnp.zeros((Dp, 5 * Dp), f32)
    for col, (w, scl) in enumerate([(params["p_WQ"], 1.0),
                                    (params["p_WK"], inv_scale),
                                    (params["p_WV"], 1.0),
                                    (params["h_WE"], 1.0),
                                    (params["p_WE"], 1.0)]):
        WpE = WpE.at[:D, col * Dp:col * Dp + D].set(w * scl)

    # misc slab: [ WO_h | WO_p | W1 | P_head ]  (all share Dp input rows)
    idx = np.arange(Dp)
    valid = idx < D
    same_head = (idx[:, None] // dh) == (idx[None, :] // dh)
    P_head = (same_head & valid[:, None] & valid[None, :]).astype(np.float32)
    Wmisc = jnp.zeros((Dp, 3 * Dp + Fp), f32)
    Wmisc = Wmisc.at[:D, 0:D].set(params["WO_h"])
    Wmisc = Wmisc.at[:D, Dp:Dp + D].set(params["WO_p"])
    Wmisc = Wmisc.at[:D, 2 * Dp:2 * Dp + 2 * D].set(params["W1"])
    Wmisc = Wmisc.at[:, 2 * Dp + Fp:].set(jnp.asarray(P_head))

    W2 = _pad2d(params["W2"], Fp, Dp)

    # all biases / BN affine params in one [8, Fp] slab
    Bias = jnp.zeros((8, Fp), f32)
    Bias = Bias.at[0, :D].set(params["bO_h"][0])
    Bias = Bias.at[1, :D].set(params["bn1_w"][0])
    Bias = Bias.at[2, :D].set(params["bn1_b"][0])
    Bias = Bias.at[3, :2 * D].set(params["b1"][0])
    Bias = Bias.at[4, :D].set(params["b2"][0])
    Bias = Bias.at[5, :D].set(params["bn2_w"][0])
    Bias = Bias.at[6, :D].set(params["bn2_b"][0])
    Bias = Bias.at[7, :D].set(params["bO_p"][0])

    args = (hp, e_p, ST, Tt, WhQKV, WpE, Wmisc, W2, Bias)

    # per-generation VMEM limit derived from the actual packed footprint,
    # capped well under physical VMEM (64 MiB on v7x, 128 MiB on v5e/v6e)
    operand_bytes = sum(int(a.size) * a.dtype.itemsize for a in args) + 2 * N * Dp * 4
    vmem_limit = int(max(8 << 20, min(4 * operand_bytes, 96 << 20)))
    try:
        cap = int(pltpu.get_tpu_info().vmem_capacity_bytes)
        vmem_limit = min(vmem_limit, (3 * cap) // 4)
    except Exception:
        pass

    vmem = pltpu.MemorySpace.VMEM
    h_out_p, p_out_p = pl.pallas_call(
        _san_layer_kernel,
        out_shape=(jax.ShapeDtypeStruct((N, Dp), f32),
                   jax.ShapeDtypeStruct((N, Dp), f32)),
        in_specs=[pl.BlockSpec(memory_space=vmem) for _ in args],
        out_specs=(pl.BlockSpec(memory_space=vmem),
                   pl.BlockSpec(memory_space=vmem)),
        compiler_params=pltpu.CompilerParams(vmem_limit_bytes=vmem_limit),
    )(*args)

    return h_out_p[:, :D], p_out_p[:, :D]


# ----------------------------------------------------------------------------
# Pure-JAX reference (original un-padded / un-folded math) for a sanity check
# ----------------------------------------------------------------------------
def _ref_forward(params, h, p, e, src, dst, num_heads):
    N, D = h.shape
    dh = D // num_heads
    scale = np.sqrt(dh)
    f32 = jnp.float32
    S = jax.nn.one_hot(src, N, dtype=f32)
    T = jax.nn.one_hot(dst, N, dtype=f32)
    HS = (jnp.arange(D)[:, None] // dh == jnp.arange(num_heads)[None, :]).astype(f32)

    def attn(x, wq, wk, wv, we):
        Qh, Kh, Vh, E = x @ wq, x @ wk, x @ wv, e @ we
        Ks, Qd, Vs = S @ Kh, T @ Qh, S @ Vh
        score = (Ks * Qd) / scale * E
        ss = jnp.exp(jnp.clip(score @ HS, -5.0, 5.0))
        Vw = Vs * (ss @ HS.T)
        wV = T.T @ Vw
        z = T.T @ ss
        return wV / (z @ HS.T + 1e-6)

    def bn(x, w, b):
        m = jnp.mean(x, axis=0, keepdims=True)
        v = jnp.mean((x - m) ** 2, axis=0, keepdims=True)
        return (x - m) * jax.lax.rsqrt(v + 1e-5) * w + b

    hp = jnp.concatenate([h, p], axis=-1)
    ha = attn(hp, params["h_WQ"], params["h_WK"], params["h_WV"], params["h_WE"])
    hh = h + (ha @ params["WO_h"] + params["bO_h"])
    hh = bn(hh, params["bn1_w"], params["bn1_b"])
    h2 = hh
    hh = jnp.maximum(hh @ params["W1"] + params["b1"], 0.0) @ params["W2"] + params["b2"]
    hh = bn(h2 + hh, params["bn2_w"], params["bn2_b"])

    pa = attn(p, params["p_WQ"], params["p_WK"], params["p_WV"], params["p_WE"])
    pp = p + jnp.tanh(pa @ params["WO_p"] + params["bO_p"])
    return hh, pp


# ----------------------------------------------------------------------------
# Main
# ----------------------------------------------------------------------------
if __name__ == "__main__":
    N = 16            # nodes
    D = 32            # in_dim == out_dim (needed for residual)
    H = 4             # num_heads
    f32 = jnp.float32

    # deterministic inputs
    key = jax.random.PRNGKey(0)
    kh, kp, ke = jax.random.split(key, 3)
    h = jax.random.normal(kh, (N, D), dtype=f32)
    p = jax.random.normal(kp, (N, D), dtype=f32)

    # small deterministic graph: bidirectional ring -> M = 2N edges
    src = jnp.concatenate([jnp.arange(N), jnp.arange(N)]).astype(jnp.int32)
    dst = jnp.concatenate([(jnp.arange(N) + 1) % N, (jnp.arange(N) - 1) % N]).astype(jnp.int32)
    M = int(src.shape[0])
    e = jax.random.normal(ke, (M, D), dtype=f32)

    # deterministic synthetic parameters ([in, out] layout, applied as x @ W)
    pkeys = jax.random.split(jax.random.PRNGKey(42), 16)
    rnd = lambda k, shp: 0.1 * jax.random.normal(k, shp, dtype=f32)
    params = {
        # attention_h (in_dim*2 -> out_dim*num_heads = D), E: D -> D, no bias
        "h_WQ": rnd(pkeys[0], (2 * D, D)), "h_WK": rnd(pkeys[1], (2 * D, D)),
        "h_WV": rnd(pkeys[2], (2 * D, D)), "h_WE": rnd(pkeys[3], (D, D)),
        # attention_p (in_dim -> D), no bias
        "p_WQ": rnd(pkeys[4], (D, D)), "p_WK": rnd(pkeys[5], (D, D)),
        "p_WV": rnd(pkeys[6], (D, D)), "p_WE": rnd(pkeys[7], (D, D)),
        # O_h, O_p
        "WO_h": rnd(pkeys[8], (D, D)), "bO_h": rnd(pkeys[9], (1, D)),
        "WO_p": rnd(pkeys[10], (D, D)), "bO_p": rnd(pkeys[11], (1, D)),
        # FFN
        "W1": rnd(pkeys[12], (D, 2 * D)), "b1": rnd(pkeys[13], (1, 2 * D)),
        "W2": rnd(pkeys[14], (2 * D, D)), "b2": rnd(pkeys[15], (1, D)),
        # BatchNorm1d default init (weight=1, bias=0)
        "bn1_w": jnp.ones((1, D), f32), "bn1_b": jnp.zeros((1, D), f32),
        "bn2_w": jnp.ones((1, D), f32), "bn2_b": jnp.zeros((1, D), f32),
    }

    h_out, p_out = san_gt_lspe_forward(params, h, p, e, src, dst, H)
    h_out = jax.block_until_ready(h_out)
    p_out = jax.block_until_ready(p_out)

    # sanity check vs plain-JAX f32 reference; tolerance covers the bf16 MXU
    # inputs used for the [M,N] gather/scatter matmuls (S/T exact 0/1, node
    # values bf16-rounded) and the Newton-refined EUP reciprocal.
    h_ref, p_ref = _ref_forward(params, h, p, e, src, dst, H)
    np.testing.assert_allclose(np.asarray(h_out), np.asarray(h_ref), rtol=1e-2, atol=1e-2)
    np.testing.assert_allclose(np.asarray(p_out), np.asarray(p_ref), rtol=1e-2, atol=1e-2)

    print("KERNEL_OK")
</pallas_src>

<mosaic_0001>
module attributes {stable_mosaic.version = 11 : i64} {
  func.func @_san_layer_kernel(%arg0: memref<16x256xf32, #tpu.memory_space<vmem>>, %arg1: memref<32x128xf32, #tpu.memory_space<vmem>>, %arg2: memref<2x32x16xbf16, #tpu.memory_space<vmem>>, %arg3: memref<16x32xbf16, #tpu.memory_space<vmem>>, %arg4: memref<256x384xf32, #tpu.memory_space<vmem>>, %arg5: memref<128x640xf32, #tpu.memory_space<vmem>>, %arg6: memref<128x512xf32, #tpu.memory_space<vmem>>, %arg7: memref<128x128xf32, #tpu.memory_space<vmem>>, %arg8: memref<8x128xf32, #tpu.memory_space<vmem>>, %arg9: memref<16x128xf32, #tpu.memory_space<vmem>>, %arg10: memref<16x128xf32, #tpu.memory_space<vmem>>) attributes {dimension_semantics = [], scalar_prefetch = 0 : i64, scratch_operands = 0 : i64, tpu.core_type = #tpu.core_type<tc>} {
    %c0 = arith.constant 0 : index
    %c0_0 = arith.constant 0 : index
    %0 = vector.load %arg0[%c0, %c0_0] : memref<16x256xf32, #tpu.memory_space<vmem>>, vector<16x256xf32>
    %1 = vector.extract_strided_slice %0 {offsets = [0, 0], sizes = [16, 128], strides = [1, 1]} : vector<16x256xf32> to vector<16x128xf32>
    %2 = vector.extract_strided_slice %0 {offsets = [0, 128], sizes = [16, 128], strides = [1, 1]} : vector<16x256xf32> to vector<16x128xf32>
    %c0_1 = arith.constant 0 : index
    %c0_2 = arith.constant 0 : index
    %3 = vector.load %arg1[%c0_1, %c0_2] : memref<32x128xf32, #tpu.memory_space<vmem>>, vector<32x128xf32>
    %c0_3 = arith.constant 0 : index
    %c0_4 = arith.constant 0 : index
    %c0_5 = arith.constant 0 : index
    %4 = vector.load %arg2[%c0_3, %c0_4, %c0_5] : memref<2x32x16xbf16, #tpu.memory_space<vmem>>, vector<1x32x16xbf16>
    %5 = vector.shape_cast %4 : vector<1x32x16xbf16> to vector<32x16xbf16>
    %c1 = arith.constant 1 : index
    %c0_6 = arith.constant 0 : index
    %c0_7 = arith.constant 0 : index
    %6 = vector.load %arg2[%c1, %c0_6, %c0_7] : memref<2x32x16xbf16, #tpu.memory_space<vmem>>, vector<1x32x16xbf16>
    %7 = vector.shape_cast %6 : vector<1x32x16xbf16> to vector<32x16xbf16>
    %c0_8 = arith.constant 0 : index
    %c0_9 = arith.constant 0 : index
    %8 = vector.load %arg3[%c0_8, %c0_9] : memref<16x32xbf16, #tpu.memory_space<vmem>>, vector<16x32xbf16>
    %c0_10 = arith.constant 0 : index
    %c0_11 = arith.constant 0 : index
    %9 = vector.load %arg6[%c0_10, %c0_11] : memref<128x512xf32, #tpu.memory_space<vmem>>, vector<128x512xf32>
    %10 = vector.extract_strided_slice %9 {offsets = [0, 0], sizes = [128, 128], strides = [1, 1]} : vector<128x512xf32> to vector<128x128xf32>
    %11 = vector.extract_strided_slice %9 {offsets = [0, 128], sizes = [128, 128], strides = [1, 1]} : vector<128x512xf32> to vector<128x128xf32>
    %12 = vector.extract_strided_slice %9 {offsets = [0, 256], sizes = [128, 128], strides = [1, 1]} : vector<128x512xf32> to vector<128x128xf32>
    %13 = vector.extract_strided_slice %9 {offsets = [0, 384], sizes = [128, 128], strides = [1, 1]} : vector<128x512xf32> to vector<128x128xf32>
    %c0_12 = arith.constant 0 : index
    %c0_13 = arith.constant 0 : index
    %14 = vector.load %arg8[%c0_12, %c0_13] : memref<8x128xf32, #tpu.memory_space<vmem>>, vector<8x128xf32>
    %15 = vector.extract_strided_slice %14 {offsets = [0, 0], sizes = [1, 128], strides = [1, 1]} : vector<8x128xf32> to vector<1x128xf32>
    %16 = vector.extract_strided_slice %14 {offsets = [1, 0], sizes = [1, 128], strides = [1, 1]} : vector<8x128xf32> to vector<1x128xf32>
    %17 = vector.extract_strided_slice %14 {offsets = [2, 0], sizes = [1, 128], strides = [1, 1]} : vector<8x128xf32> to vector<1x128xf32>
    %18 = vector.extract_strided_slice %14 {offsets = [3, 0], sizes = [1, 128], strides = [1, 1]} : vector<8x128xf32> to vector<1x128xf32>
    %19 = vector.extract_strided_slice %14 {offsets = [4, 0], sizes = [1, 128], strides = [1, 1]} : vector<8x128xf32> to vector<1x128xf32>
    %20 = vector.extract_strided_slice %14 {offsets = [5, 0], sizes = [1, 128], strides = [1, 1]} : vector<8x128xf32> to vector<1x128xf32>
    %21 = vector.extract_strided_slice %14 {offsets = [6, 0], sizes = [1, 128], strides = [1, 1]} : vector<8x128xf32> to vector<1x128xf32>
    %22 = vector.extract_strided_slice %14 {offsets = [7, 0], sizes = [1, 128], strides = [1, 1]} : vector<8x128xf32> to vector<1x128xf32>
    %c0_14 = arith.constant 0 : index
    %c0_15 = arith.constant 0 : index
    %23 = vector.load %arg4[%c0_14, %c0_15] : memref<256x384xf32, #tpu.memory_space<vmem>>, vector<256x384xf32>
    %cst = arith.constant dense<0.000000e+00> : vector<16x384xf32>
    %24 = tpu.matmul %0, %23, %cst {dimension_numbers = #tpu.dot_dimension_numbers<[1], [0], [0], [1], [0, 0, 1, 1], [], []>} : vector<16x256xf32>, vector<256x384xf32>, vector<16x384xf32> -> vector<16x384xf32>
    %c0_16 = arith.constant 0 : index
    %c0_17 = arith.constant 0 : index
    %25 = vector.load %arg5[%c0_16, %c0_17] : memref<128x640xf32, #tpu.memory_space<vmem>>, vector<128x640xf32>
    %26 = vector.extract_strided_slice %25 {offsets = [0, 0], sizes = [128, 384], strides = [1, 1]} : vector<128x640xf32> to vector<128x384xf32>
    %cst_18 = arith.constant dense<0.000000e+00> : vector<16x384xf32>
    %27 = tpu.matmul %2, %26, %cst_18 {dimension_numbers = #tpu.dot_dimension_numbers<[1], [0], [0], [1], [0, 0, 1, 1], [], []>} : vector<16x128xf32>, vector<128x384xf32>, vector<16x384xf32> -> vector<16x384xf32>
    %28 = vector.extract_strided_slice %25 {offsets = [0, 384], sizes = [128, 256], strides = [1, 1]} : vector<128x640xf32> to vector<128x256xf32>
    %cst_19 = arith.constant dense<0.000000e+00> : vector<32x256xf32>
    %29 = tpu.matmul %3, %28, %cst_19 {dimension_numbers = #tpu.dot_dimension_numbers<[1], [0], [0], [1], [0, 0, 1, 1], [], []>} : vector<32x128xf32>, vector<128x256xf32>, vector<32x256xf32> -> vector<32x256xf32>
    %30 = vector.extract_strided_slice %24 {offsets = [0, 0], sizes = [16, 128], strides = [1, 1]} : vector<16x384xf32> to vector<16x128xf32>
    %31 = vector.extract_strided_slice %24 {offsets = [0, 128], sizes = [16, 128], strides = [1, 1]} : vector<16x384xf32> to vector<16x128xf32>
    %32 = vector.extract_strided_slice %24 {offsets = [0, 256], sizes = [16, 128], strides = [1, 1]} : vector<16x384xf32> to vector<16x128xf32>
    %33 = vector.extract_strided_slice %29 {offsets = [0, 0], sizes = [32, 128], strides = [1, 1]} : vector<32x256xf32> to vector<32x128xf32>
    %34 = arith.truncf %31 : vector<16x128xf32> to vector<16x128xbf16>
    %cst_20 = arith.constant dense<0.000000e+00> : vector<32x128xf32>
    %35 = tpu.matmul %5, %34, %cst_20 {dimension_numbers = #tpu.dot_dimension_numbers<[1], [0], [0], [1], [0, 0, 1, 1], [], []>} : vector<32x16xbf16>, vector<16x128xbf16>, vector<32x128xf32> -> vector<32x128xf32>
    %36 = arith.truncf %30 : vector<16x128xf32> to vector<16x128xbf16>
    %cst_21 = arith.constant dense<0.000000e+00> : vector<32x128xf32>
    %37 = tpu.matmul %7, %36, %cst_21 {dimension_numbers = #tpu.dot_dimension_numbers<[1], [0], [0], [1], [0, 0, 1, 1], [], []>} : vector<32x16xbf16>, vector<16x128xbf16>, vector<32x128xf32> -> vector<32x128xf32>
    %38 = arith.truncf %32 : vector<16x128xf32> to vector<16x128xbf16>
    %cst_22 = arith.constant dense<0.000000e+00> : vector<32x128xf32>
    %39 = tpu.matmul %5, %38, %cst_22 {dimension_numbers = #tpu.dot_dimension_numbers<[1], [0], [0], [1], [0, 0, 1, 1], [], []>} : vector<32x16xbf16>, vector<16x128xbf16>, vector<32x128xf32> -> vector<32x128xf32>
    %40 = arith.mulf %35, %37 : vector<32x128xf32>
    %41 = arith.mulf %40, %33 : vector<32x128xf32>
    %cst_23 = arith.constant dense<0.000000e+00> : vector<32x128xf32>
    %42 = tpu.matmul %41, %13, %cst_23 {dimension_numbers = #tpu.dot_dimension_numbers<[1], [0], [0], [1], [0, 0, 1, 1], [], []>} : vector<32x128xf32>, vector<128x128xf32>, vector<32x128xf32> -> vector<32x128xf32>
    %cst_24 = arith.constant -5.000000e+00 : f32
    %cst_25 = arith.constant 5.000000e+00 : f32
    %43 = vector.broadcast %cst_24 : f32 to vector<32x128xf32>
    %44 = arith.maximumf %43, %42 : vector<32x128xf32>
    %45 = vector.broadcast %cst_25 : f32 to vector<32x128xf32>
    %46 = arith.minimumf %45, %44 : vector<32x128xf32>
    %47 = math.exp %46 : vector<32x128xf32>
    %48 = arith.mulf %39, %47 : vector<32x128xf32>
    %49 = arith.truncf %48 : vector<32x128xf32> to vector<32x128xbf16>
    %cst_26 = arith.constant dense<0.000000e+00> : vector<16x128xf32>
    %50 = tpu.matmul %8, %49, %cst_26 {dimension_numbers = #tpu.dot_dimension_numbers<[1], [0], [0], [1], [0, 0, 1, 1], [], []>} : vector<16x32xbf16>, vector<32x128xbf16>, vector<16x128xf32> -> vector<16x128xf32>
    %51 = arith.truncf %47 : vector<32x128xf32> to vector<32x128xbf16>
    %cst_27 = arith.constant dense<0.000000e+00> : vector<16x128xf32>
    %52 = tpu.matmul %8, %51, %cst_27 {dimension_numbers = #tpu.dot_dimension_numbers<[1], [0], [0], [1], [0, 0, 1, 1], [], []>} : vector<16x32xbf16>, vector<32x128xbf16>, vector<16x128xf32> -> vector<16x128xf32>
    %cst_28 = arith.constant 9.99999997E-7 : f32
    %53 = vector.broadcast %cst_28 : f32 to vector<16x128xf32>
    %54 = arith.addf %52, %53 : vector<16x128xf32>
    %55 = tpu.reciprocal %54 {approx = true} : vector<16x128xf32> -> vector<16x128xf32>
    %56 = arith.mulf %54, %55 : vector<16x128xf32>
    %cst_29 = arith.constant 2.000000e+00 : f32
    %57 = vector.broadcast %cst_29 : f32 to vector<16x128xf32>
    %58 = arith.subf %57, %56 : vector<16x128xf32>
    %59 = arith.mulf %55, %58 : vector<16x128xf32>
    %60 = arith.mulf %50, %59 : vector<16x128xf32>
    %cst_30 = arith.constant dense<0.000000e+00> : vector<16x128xf32>
    %61 = tpu.matmul %60, %10, %cst_30 {dimension_numbers = #tpu.dot_dimension_numbers<[1], [0], [0], [1], [0, 0, 1, 1], [], []>} : vector<16x128xf32>, vector<128x128xf32>, vector<16x128xf32> -> vector<16x128xf32>
    %62 = vector.broadcast %15 : vector<1x128xf32> to vector<16x128xf32>
    %63 = arith.addf %61, %62 : vector<16x128xf32>
    %64 = arith.addf %1, %63 : vector<16x128xf32>
    %cst_31 = arith.constant dense<0.000000e+00> : vector<128xf32>
    %65 = vector.multi_reduction <add>, %64, %cst_31 [0] : vector<16x128xf32> to vector<128xf32>
    %66 = vector.shape_cast %65 : vector<128xf32> to vector<1x128xf32>
    %cst_32 = arith.constant 1.600000e+01 : f32
    %67 = vector.broadcast %cst_32 : f32 to vector<1x128xf32>
    %68 = arith.divf %66, %67 : vector<1x128xf32>
    %69 = vector.broadcast %68 : vector<1x128xf32> to vector<16x128xf32>
    %70 = arith.subf %64, %69 : vector<16x128xf32>
    %71 = arith.mulf %70, %70 : vector<16x128xf32>
    %cst_33 = arith.constant dense<0.000000e+00> : vector<128xf32>
    %72 = vector.multi_reduction <add>, %71, %cst_33 [0] : vector<16x128xf32> to vector<128xf32>
    %73 = vector.shape_cast %72 : vector<128xf32> to vector<1x128xf32>
    %cst_34 = arith.constant 1.600000e+01 : f32
    %74 = vector.broadcast %cst_34 : f32 to vector<1x128xf32>
    %75 = arith.divf %73, %74 : vector<1x128xf32>
    %76 = vector.broadcast %68 : vector<1x128xf32> to vector<16x128xf32>
    %77 = arith.subf %64, %76 : vector<16x128xf32>
    %cst_35 = arith.constant 9.99999974E-6 : f32
    %78 = vector.broadcast %cst_35 : f32 to vector<1x128xf32>
    %79 = arith.addf %75, %78 : vector<1x128xf32>
    %80 = math.rsqrt %79 : vector<1x128xf32>
    %81 = vector.broadcast %80 : vector<1x128xf32> to vector<16x128xf32>
    %82 = arith.mulf %77, %81 : vector<16x128xf32>
    %83 = vector.broadcast %16 : vector<1x128xf32> to vector<16x128xf32>
    %84 = arith.mulf %82, %83 : vector<16x128xf32>
    %85 = vector.broadcast %17 : vector<1x128xf32> to vector<16x128xf32>
    %86 = arith.addf %84, %85 : vector<16x128xf32>
    %cst_36 = arith.constant dense<0.000000e+00> : vector<16x128xf32>
    %87 = tpu.matmul %86, %12, %cst_36 {dimension_numbers = #tpu.dot_dimension_numbers<[1], [0], [0], [1], [0, 0, 1, 1], [], []>} : vector<16x128xf32>, vector<128x128xf32>, vector<16x128xf32> -> vector<16x128xf32>
    %88 = vector.broadcast %18 : vector<1x128xf32> to vector<16x128xf32>
    %89 = arith.addf %87, %88 : vector<16x128xf32>
    %cst_37 = arith.constant 0.000000e+00 : f32
    %90 = vector.broadcast %cst_37 : f32 to vector<16x128xf32>
    %91 = arith.maximumf %89, %90 : vector<16x128xf32>
    %c0_38 = arith.constant 0 : index
    %c0_39 = arith.constant 0 : index
    %92 = vector.load %arg7[%c0_38, %c0_39] : memref<128x128xf32, #tpu.memory_space<vmem>>, vector<128x128xf32>
    %cst_40 = arith.constant dense<0.000000e+00> : vector<16x128xf32>
    %93 = tpu.matmul %91, %92, %cst_40 {dimension_numbers = #tpu.dot_dimension_numbers<[1], [0], [0], [1], [0, 0, 1, 1], [], []>} : vector<16x128xf32>, vector<128x128xf32>, vector<16x128xf32> -> vector<16x128xf32>
    %94 = vector.broadcast %19 : vector<1x128xf32> to vector<16x128xf32>
    %95 = arith.addf %93, %94 : vector<16x128xf32>
    %96 = arith.addf %86, %95 : vector<16x128xf32>
    %cst_41 = arith.constant dense<0.000000e+00> : vector<128xf32>
    %97 = vector.multi_reduction <add>, %96, %cst_41 [0] : vector<16x128xf32> to vector<128xf32>
    %98 = vector.shape_cast %97 : vector<128xf32> to vector<1x128xf32>
    %cst_42 = arith.constant 1.600000e+01 : f32
    %99 = vector.broadcast %cst_42 : f32 to vector<1x128xf32>
    %100 = arith.divf %98, %99 : vector<1x128xf32>
    %101 = vector.broadcast %100 : vector<1x128xf32> to vector<16x128xf32>
    %102 = arith.subf %96, %101 : vector<16x128xf32>
    %103 = arith.mulf %102, %102 : vector<16x128xf32>
    %cst_43 = arith.constant dense<0.000000e+00> : vector<128xf32>
    %104 = vector.multi_reduction <add>, %103, %cst_43 [0] : vector<16x128xf32> to vector<128xf32>
    %105 = vector.shape_cast %104 : vector<128xf32> to vector<1x128xf32>
    %cst_44 = arith.constant 1.600000e+01 : f32
    %106 = vector.broadcast %cst_44 : f32 to vector<1x128xf32>
    %107 = arith.divf %105, %106 : vector<1x128xf32>
    %108 = vector.broadcast %100 : vector<1x128xf32> to vector<16x128xf32>
    %109 = arith.subf %96, %108 : vector<16x128xf32>
    %cst_45 = arith.constant 9.99999974E-6 : f32
    %110 = vector.broadcast %cst_45 : f32 to vector<1x128xf32>
    %111 = arith.addf %107, %110 : vector<1x128xf32>
    %112 = math.rsqrt %111 : vector<1x128xf32>
    %113 = vector.broadcast %112 : vector<1x128xf32> to vector<16x128xf32>
    %114 = arith.mulf %109, %113 : vector<16x128xf32>
    %115 = vector.broadcast %20 : vector<1x128xf32> to vector<16x128xf32>
    %116 = arith.mulf %114, %115 : vector<16x128xf32>
    %117 = vector.broadcast %21 : vector<1x128xf32> to vector<16x128xf32>
    %118 = arith.addf %116, %117 : vector<16x128xf32>
    %c0_46 = arith.constant 0 : index
    %c0_47 = arith.constant 0 : index
    %119 = vector.load %arg9[%c0_46, %c0_47] : memref<16x128xf32, #tpu.memory_space<vmem>>, vector<16x128xf32>
    tpu.vector_store %arg9[%c0_46, %c0_47], %118 {strides = array<i32>} : memref<16x128xf32, #tpu.memory_space<vmem>>, vector<16x128xf32>,
    %120 = vector.extract_strided_slice %27 {offsets = [0, 0], sizes = [16, 128], strides = [1, 1]} : vector<16x384xf32> to vector<16x128xf32>
    %121 = vector.extract_strided_slice %27 {offsets = [0, 128], sizes = [16, 128], strides = [1, 1]} : vector<16x384xf32> to vector<16x128xf32>
    %122 = vector.extract_strided_slice %27 {offsets = [0, 256], sizes = [16, 128], strides = [1, 1]} : vector<16x384xf32> to vector<16x128xf32>
    %123 = vector.extract_strided_slice %29 {offsets = [0, 128], sizes = [32, 128], strides = [1, 1]} : vector<32x256xf32> to vector<32x128xf32>
    %124 = arith.truncf %121 : vector<16x128xf32> to vector<16x128xbf16>
    %cst_48 = arith.constant dense<0.000000e+00> : vector<32x128xf32>
    %125 = tpu.matmul %5, %124, %cst_48 {dimension_numbers = #tpu.dot_dimension_numbers<[1], [0], [0], [1], [0, 0, 1, 1], [], []>} : vector<32x16xbf16>, vector<16x128xbf16>, vector<32x128xf32> -> vector<32x128xf32>
    %126 = arith.truncf %120 : vector<16x128xf32> to vector<16x128xbf16>
    %cst_49 = arith.constant dense<0.000000e+00> : vector<32x128xf32>
    %127 = tpu.matmul %7, %126, %cst_49 {dimension_numbers = #tpu.dot_dimension_numbers<[1], [0], [0], [1], [0, 0, 1, 1], [], []>} : vector<32x16xbf16>, vector<16x128xbf16>, vector<32x128xf32> -> vector<32x128xf32>
    %128 = arith.truncf %122 : vector<16x128xf32> to vector<16x128xbf16>
    %cst_50 = arith.constant dense<0.000000e+00> : vector<32x128xf32>
    %129 = tpu.matmul %5, %128, %cst_50 {dimension_numbers = #tpu.dot_dimension_numbers<[1], [0], [0], [1], [0, 0, 1, 1], [], []>} : vector<32x16xbf16>, vector<16x128xbf16>, vector<32x128xf32> -> vector<32x128xf32>
    %130 = arith.mulf %125, %127 : vector<32x128xf32>
    %131 = arith.mulf %130, %123 : vector<32x128xf32>
    %cst_51 = arith.constant dense<0.000000e+00> : vector<32x128xf32>
    %132 = tpu.matmul %131, %13, %cst_51 {dimension_numbers = #tpu.dot_dimension_numbers<[1], [0], [0], [1], [0, 0, 1, 1], [], []>} : vector<32x128xf32>, vector<128x128xf32>, vector<32x128xf32> -> vector<32x128xf32>
    %cst_52 = arith.constant -5.000000e+00 : f32
    %cst_53 = arith.constant 5.000000e+00 : f32
    %133 = vector.broadcast %cst_52 : f32 to vector<32x128xf32>
    %134 = arith.maximumf %133, %132 : vector<32x128xf32>
    %135 = vector.broadcast %cst_53 : f32 to vector<32x128xf32>
    %136 = arith.minimumf %135, %134 : vector<32x128xf32>
    %137 = math.exp %136 : vector<32x128xf32>
    %138 = arith.mulf %129, %137 : vector<32x128xf32>
    %139 = arith.truncf %138 : vector<32x128xf32> to vector<32x128xbf16>
    %cst_54 = arith.constant dense<0.000000e+00> : vector<16x128xf32>
    %140 = tpu.matmul %8, %139, %cst_54 {dimension_numbers = #tpu.dot_dimension_numbers<[1], [0], [0], [1], [0, 0, 1, 1], [], []>} : vector<16x32xbf16>, vector<32x128xbf16>, vector<16x128xf32> -> vector<16x128xf32>
    %141 = arith.truncf %137 : vector<32x128xf32> to vector<32x128xbf16>
    %cst_55 = arith.constant dense<0.000000e+00> : vector<16x128xf32>
    %142 = tpu.matmul %8, %141, %cst_55 {dimension_numbers = #tpu.dot_dimension_numbers<[1], [0], [0], [1], [0, 0, 1, 1], [], []>} : vector<16x32xbf16>, vector<32x128xbf16>, vector<16x128xf32> -> vector<16x128xf32>
    %cst_56 = arith.constant 9.99999997E-7 : f32
    %143 = vector.broadcast %cst_56 : f32 to vector<16x128xf32>
    %144 = arith.addf %142, %143 : vector<16x128xf32>
    %145 = tpu.reciprocal %144 {approx = true} : vector<16x128xf32> -> vector<16x128xf32>
    %146 = arith.mulf %144, %145 : vector<16x128xf32>
    %cst_57 = arith.constant 2.000000e+00 : f32
    %147 = vector.broadcast %cst_57 : f32 to vector<16x128xf32>
    %148 = arith.subf %147, %146 : vector<16x128xf32>
    %149 = arith.mulf %145, %148 : vector<16x128xf32>
    %150 = arith.mulf %140, %149 : vector<16x128xf32>
    %cst_58 = arith.constant dense<0.000000e+00> : vector<16x128xf32>
    %151 = tpu.matmul %150, %11, %cst_58 {dimension_numbers = #tpu.dot_dimension_numbers<[1], [0], [0], [1], [0, 0, 1, 1], [], []>} : vector<16x128xf32>, vector<128x128xf32>, vector<16x128xf32> -> vector<16x128xf32>
    %152 = vector.broadcast %22 : vector<1x128xf32> to vector<16x128xf32>
    %153 = arith.addf %151, %152 : vector<16x128xf32>
    %154 = math.tanh %153 : vector<16x128xf32>
    %155 = arith.addf %2, %154 : vector<16x128xf32>
    %c0_59 = arith.constant 0 : index
    %c0_60 = arith.constant 0 : index
    %156 = vector.load %arg10[%c0_59, %c0_60] : memref<16x128xf32, #tpu.memory_space<vmem>>, vector<16x128xf32>
    tpu.vector_store %arg10[%c0_59, %c0_60], %155 {strides = array<i32>} : memref<16x128xf32, #tpu.memory_space<vmem>>, vector<16x128xf32>,
    return
  }
}

</mosaic_0001>

<bundles_post_ra>
// kernel: tpu_custom_call.1
= control target key start
LH: loop header
LB: loop body
LE: loop exit
PB: predicated region body
PF: predicated region fallthrough
CT: control target
= control target key end

     0   :  { %16 = vsyncpa [#allocation3], 0  ;;  %s1894_s0 = inlined_call_operand.vmem [shape: f32[16,256], index: 0, kind: input, shape index: {}]   ;;  %s1895_s1 = inlined_call_operand.hbm [shape: f32[32,128], index: 1, kind: input, shape index: {}]   ;;  %s1896_s2 = inlined_call_operand.vmem [shape: bf16[2,32,16], index: 2, kind: input, shape index: {}]   ;;  %s1897_s3 = inlined_call_operand.vmem [shape: bf16[16,32], index: 3, kind: input, shape index: {}]   ;;  %s1898_s4 = inlined_call_operand.hbm [shape: f32[256,384], index: 4, kind: input, shape index: {}]   ;;  %s1899_s5 = inlined_call_operand.hbm [shape: f32[128,640], index: 5, kind: input, shape index: {}]   ;;  %s1900_s6 = inlined_call_operand.hbm [shape: f32[128,512], index: 6, kind: input, shape index: {}]   ;;  %s1901_s7 = inlined_call_operand.hbm [shape: f32[128,128], index: 7, kind: input, shape index: {}]   ;;  %s1902_s8 = inlined_call_operand.vmem [shape: f32[8,128], index: 8, kind: input, shape index: {}]   ;;  %s1903_s9 = inlined_call_operand.hbm [shape: f32[16,128], index: 9, kind: output, shape index: {0}]   ;;  %s1904_s10 = inlined_call_operand.hbm [shape: f32[16,128], index: 10, kind: output, shape index: {1}]  }
   0x1   :  { %17 = vsyncpa [#allocation6], 0 }
   0x2   :  { %18 = vsyncpa [#allocation9], 0 }
   0x3   :  { %19 = vsyncpa [#allocation4], 0  ;;  %s44_s15 = sshll.u32 %s1898_s4, 4  ;;  %s45_s15 = int_to_ptr.hbm [resolvable:$true] %s44_s15 }
   0x4   :  { %20 = vsyncpa [#allocation13], 0  ;;  %s1550_s16 = smov [#allocation5]   ;;  %s70_s20 = sshll.u32 %s1900_s6, 4  ;;  %s71_s20 = int_to_ptr.hbm [resolvable:$true] %s70_s20 }
   0x5   :  { %s46_s17 = sshll.u32 %s1550_s16, 4  ;;  %s1551_s21 = smov 384   ;;  %s47_s17 = int_to_ptr.vmem [resolvable:$true] %s46_s17 }
   0x6   :  { %s1552_s22 = smov 24   ;;  %s1553_s23 = smov [#allocation8]  }
   0x7   :  { %52 = dma.hbm_to_vmem [thread:$0]  %s45_s15, 12288, %s47_s17, [#allocation6], %s1551_s21, %s1551_s21, %s1552_s22  }
   0x8   :  { %s72_s24 = sshll.u32 %s1553_s23, 4  ;;  %s1554_s25 = smov 512   ;;  %s73_s24 = int_to_ptr.vmem [resolvable:$true] %s72_s24 }
   0x9   :  { %s1555_s26 = smov 32   ;;  %s27_s28 = sshll.u32 %s1895_s1, 4  ;;  %s28_s28 = int_to_ptr.hbm [resolvable:$true] %s27_s28 }
   0xa   :  { %78 = dma.hbm_to_vmem [thread:$0]  %s71_s20, 8192, %s73_s24, [#allocation9], %s1554_s25, %s1554_s25, %s1555_s26  }
   0xb   :  { %s1556_s29 = smov [#allocation2]   ;;  %s57_s12 = sshll.u32 %s1899_s5, 4  ;;  %s58_s12 = int_to_ptr.hbm [resolvable:$true] %s57_s12 }
   0xc   :  { %s29_s30 = sshll.u32 %s1556_s29, 4  ;;  %s1557_s13 = smov 128   ;;  %s30_s30 = int_to_ptr.vmem [resolvable:$true] %s29_s30 }
   0xd   :  { %s1558_s14 = smov 8   ;;  %s1559_s15 = smov [#allocation7]  }
   0xe   :  { %35 = dma.hbm_to_vmem [thread:$0]  %s28_s28, 512, %s30_s30, [#allocation3], %s1557_s13, %s1557_s13, %s1558_s14  }
   0xf   :  { %s59_s16 = sshll.u32 %s1559_s15, 4  ;;  %s1560_s17 = smov 640   ;;  %s60_s16 = int_to_ptr.vmem [resolvable:$true] %s59_s16 }
  0x10   :  { %s1561_s1 = smov 40   ;;  %s83_s20 = sshll.u32 %s1901_s7, 4  ;;  %s84_s20 = int_to_ptr.hbm [resolvable:$true] %s83_s20 }
  0x11   :  { %65 = dma.hbm_to_vmem [thread:$0]  %s58_s12, 10240, %s60_s16, [#allocation6], %s1560_s17, %s1560_s17, %s1561_s1  }
  0x12   :  { %s1562_s21 = smov [#allocation10]  }
  0x13   :  { %s85_s5 = sshll.u32 %s1562_s21, 4  ;;  %s86_s5 = int_to_ptr.vmem [resolvable:$true] %s85_s5 }
  0x14   :  { %91 = dma.hbm_to_vmem [thread:$0]  %s84_s20, 2048, %s86_s5, [#allocation9], %s1557_s13, %s1557_s13, %s1558_s14  }
  0x15   :  { %1540 = dma.done.wait [#allocation3], 512  }
  0x16   :  { %1541 = vsyncadd [#allocation3], 4294966784 }
  0x17   :  { %1542 = dma.done.wait [#allocation6], 22528  }
  0x18   :  { %1543 = vsyncadd [#allocation6], 4294944768 }
  0x19   :  { %1544 = dma.done.wait [#allocation9], 10240  }
  0x1a   :  { %1545 = vsyncadd [#allocation9], 4294957056  ;;  %v245_v0 = vld [vmem:[#allocation5 + $0x170] sm:$0xff]  ;;  %v242_v2 = vld [vmem:[#allocation5 + $0x158] sm:$0xff]  ;;  %vm651_vm0 = vcmask 130048   ;;  %vm797_vm1 = vcmask 261120  }
  0x1b   :  { %v293_v1 = vld [vmem:[#allocation5 + $0x2f0] sm:$0xff]  ;;  %341 = vmatpush.msra.mxu2 %v245_v0  ;;  %v290_v3 = vld [vmem:[#allocation5 + $0x2d8] sm:$0xff]  ;;  %v244_v4 = vld [vmem:[#allocation5 + $0x168] sm:$0xff]  ;;  %s1217_s21 = sshll.u32 %s1903_s9, 4  ;;  %s1564_s5 = smov [#allocation11]   ;;  %s1218_s21 = int_to_ptr.hbm [resolvable:$true] %s1217_s21 }
  0x1c   :  { %364 = vmatpush.msra.mxu3 %v293_v1  ;;  %v292_v5 = vld [vmem:[#allocation5 + $0x2e8] sm:$0xff]  ;;  %295 = vmatpush.msra.mxu0 %v244_v4  ;;  %v239_v6 = vld [vmem:[#allocation5 + $0x140] sm:$0xff]  ;;  %v241_v8 = vld [vmem:[#allocation5 + $0x150] sm:$0xff]  ;;  %s1215_s7 = sshll.u32 %s1564_s5, 4  ;;  %s1565_s9 = smov [#allocation12]   ;;  %s1216_s7 = int_to_ptr.vmem [resolvable:$true] %s1215_s7 }
  0x1d   :  { %318 = vmatpush.msra.mxu1 %v292_v5  ;;  %v287_v7 = vld [vmem:[#allocation5 + $0x2c0] sm:$0xff]  ;;  %342 = vmatpush.msra.mxu2 %v242_v2  ;;  %v289_v9 = vld [vmem:[#allocation5 + $0x2d0] sm:$0xff]  ;;  %v236_v10 = vld [vmem:[#allocation5 + $0x128] sm:$0xff]  ;;  %s1228_s24 = sshll.u32 %s1565_s9, 4  ;;  %s1230_s4 = sshll.u32 %s1904_s10, 4  ;;  %s1229_s24 = int_to_ptr.vmem [resolvable:$true] %s1228_s24  ;;  %s1231_s4 = int_to_ptr.hbm [resolvable:$true] %s1230_s4 }
  0x1e   :  { %365 = vmatpush.msra.mxu3 %v290_v3  ;;  %296 = vmatpush.msra.mxu0 %v241_v8  ;;  %v284_v11 = vld [vmem:[#allocation5 + $0x2a8] sm:$0xff]  ;;  %v238_v12 = vld [vmem:[#allocation5 + $0x138] sm:$0xff]  ;;  %v235_v14 = vld [vmem:[#allocation5 + $0x120] sm:$0xff] }
  0x1f   :  { %319 = vmatpush.msra.mxu1 %v289_v9  ;;  %v286_v13 = vld [vmem:[#allocation5 + $0x2b8] sm:$0xff]  ;;  %343 = vmatpush.msra.mxu2 %v239_v6  ;;  %v283_v15 = vld [vmem:[#allocation5 + $0x2a0] sm:$0xff]  ;;  %v233_v16 = vld [vmem:[#allocation5 + $0x110] sm:$0xff] }
  0x20   :  { %366 = vmatpush.msra.mxu3 %v287_v7  ;;  %297 = vmatpush.msra.mxu0 %v238_v12  ;;  %v281_v17 = vld [vmem:[#allocation5 + $0x290] sm:$0xff]  ;;  %v232_v18 = vld [vmem:[#allocation5 + $0x108] sm:$0xff]  ;;  %v230_v20 = vld [vmem:[#allocation5 + $0xf8] sm:$0xff] }
  0x21   :  { %320 = vmatpush.msra.mxu1 %v286_v13  ;;  %344 = vmatpush.msra.mxu2 %v236_v10  ;;  %v280_v19 = vld [vmem:[#allocation5 + $0x288] sm:$0xff]  ;;  %v278_v21 = vld [vmem:[#allocation5 + $0x278] sm:$0xff]  ;;  %v229_v22 = vld [vmem:[#allocation5 + $0xf0] sm:$0xff] }
  0x22   :  { %367 = vmatpush.msra.mxu3 %v284_v11  ;;  %298 = vmatpush.msra.mxu0 %v235_v14  ;;  %v277_v23 = vld [vmem:[#allocation5 + $0x270] sm:$0xff]  ;;  %v227_v24 = vld [vmem:[#allocation5 + $0xe0] sm:$0xff]  ;;  %v226_v26 = vld [vmem:[#allocation5 + $0xd8] sm:$0xff] }
  0x23   :  { %321 = vmatpush.msra.mxu1 %v283_v15  ;;  %345 = vmatpush.msra.mxu2 %v233_v16  ;;  %v275_v25 = vld [vmem:[#allocation5 + $0x260] sm:$0xff]  ;;  %v274_v27 = vld [vmem:[#allocation5 + $0x258] sm:$0xff]  ;;  %v224_v28 = vld [vmem:[#allocation5 + $0xc8] sm:$0xff] }
  0x24   :  { %368 = vmatpush.msra.mxu3 %v281_v17  ;;  %299 = vmatpush.msra.mxu0 %v232_v18  ;;  %v272_v29 = vld [vmem:[#allocation5 + $0x248] sm:$0xff]  ;;  %v223_v30 = vld [vmem:[#allocation5 + $0xc0] sm:$0xff]  ;;  %v221_v32 = vld [vmem:[#allocation5 + $0xb0] sm:$0xff] }
  0x25   :  { %322 = vmatpush.msra.mxu1 %v280_v19  ;;  %346 = vmatpush.msra.mxu2 %v230_v20  ;;  %v271_v31 = vld [vmem:[#allocation5 + $0x240] sm:$0xff]  ;;  %v269_v33 = vld [vmem:[#allocation5 + $0x230] sm:$0xff]  ;;  %v220_v34 = vld [vmem:[#allocation5 + $0xa8] sm:$0xff] }
  0x26   :  { %369 = vmatpush.msra.mxu3 %v278_v21  ;;  %300 = vmatpush.msra.mxu0 %v229_v22  ;;  %v268_v35 = vld [vmem:[#allocation5 + $0x228] sm:$0xff]  ;;  %v218_v36 = vld [vmem:[#allocation5 + $0x98] sm:$0xff]  ;;  %v217_v38 = vld [vmem:[#allocation5 + $0x90] sm:$0xff] }
  0x27   :  { %323 = vmatpush.msra.mxu1 %v277_v23  ;;  %347 = vmatpush.msra.mxu2 %v227_v24  ;;  %v266_v37 = vld [vmem:[#allocation5 + $0x218] sm:$0xff]  ;;  %v265_v39 = vld [vmem:[#allocation5 + $0x210] sm:$0xff]  ;;  %v215_v40 = vld [vmem:[#allocation5 + $0x80] sm:$0xff] }
  0x28   :  { %370 = vmatpush.msra.mxu3 %v275_v25  ;;  %301 = vmatpush.msra.mxu0 %v226_v26  ;;  %v263_v41 = vld [vmem:[#allocation5 + $0x200] sm:$0xff]  ;;  %v214_v42 = vld [vmem:[#allocation5 + $0x78] sm:$0xff]  ;;  %v212_v44 = vld [vmem:[#allocation5 + $0x68] sm:$0xff] }
  0x29   :  { %324 = vmatpush.msra.mxu1 %v274_v27  ;;  %348 = vmatpush.msra.mxu2 %v224_v28  ;;  %v262_v43 = vld [vmem:[#allocation5 + $0x1f8] sm:$0xff]  ;;  %v260_v45 = vld [vmem:[#allocation5 + $0x1e8] sm:$0xff]  ;;  %v211_v46 = vld [vmem:[#allocation5 + $0x60] sm:$0xff] }
  0x2a   :  { %371 = vmatpush.msra.mxu3 %v272_v29  ;;  %302 = vmatpush.msra.mxu0 %v223_v30  ;;  %v259_v47 = vld [vmem:[#allocation5 + $0x1e0] sm:$0xff]  ;;  %v209_v48 = vld [vmem:[#allocation5 + $0x50] sm:$0xff]  ;;  %v208_v50 = vld [vmem:[#allocation5 + $0x48] sm:$0xff] }
  0x2b   :  { %325 = vmatpush.msra.mxu1 %v271_v31  ;;  %349 = vmatpush.msra.mxu2 %v221_v32  ;;  %v257_v49 = vld [vmem:[#allocation5 + $0x1d0] sm:$0xff]  ;;  %v256_v51 = vld [vmem:[#allocation5 + $0x1c8] sm:$0xff]  ;;  %v206_v52 = vld [vmem:[#allocation5 + $0x38] sm:$0xff] }
  0x2c   :  { %372 = vmatpush.msra.mxu3 %v269_v33  ;;  %303 = vmatpush.msra.mxu0 %v220_v34  ;;  %v254_v53 = vld [vmem:[#allocation5 + $0x1b8] sm:$0xff]  ;;  %v205_v54 = vld [vmem:[#allocation5 + $0x30] sm:$0xff]  ;;  %v203_v56 = vld [vmem:[#allocation5 + $0x20] sm:$0xff] }
  0x2d   :  { %326 = vmatpush.msra.mxu1 %v268_v35  ;;  %350 = vmatpush.msra.mxu2 %v218_v36  ;;  %v253_v55 = vld [vmem:[#allocation5 + $0x1b0] sm:$0xff]  ;;  %v251_v57 = vld [vmem:[#allocation5 + $0x1a0] sm:$0xff]  ;;  %v202_v58 = vld [vmem:[#allocation5 + $0x18] sm:$0xff] }
  0x2e   :  { %373 = vmatpush.msra.mxu3 %v266_v37  ;;  %304 = vmatpush.msra.mxu0 %v217_v38  ;;  %v250_v59 = vld [vmem:[#allocation5 + $0x198] sm:$0xff]  ;;  %v200_v60 = vld [vmem:[#allocation5 + $0x8] sm:$0xff]  ;;  %v1645_v62 = vld [vmem:[%s1894_s0] sm:$0xff] }
  0x2f   :  { %327 = vmatpush.msra.mxu1 %v265_v39  ;;  %351 = vmatpush.msra.mxu2 %v215_v40  ;;  %v248_v61 = vld [vmem:[#allocation5 + $0x188] sm:$0xff]  ;;  %v199_v0 = vld [vmem:[#allocation5] sm:$0xff]  ;;  %v246_v2 = vld [vmem:[#allocation5 + $0x178] sm:$0xff] }
  0x30   :  { %374 = vmatpush.msra.mxu3 %v263_v41  ;;  %305 = vmatpush.msra.mxu0 %v214_v42  ;;  %v1650_v63 = vld [vmem:[%s1894_s0 + $0x8] sm:$0xff]  ;;  %v247_v1 = vld [vmem:[#allocation5 + $0x180] sm:$0xff]  ;;  %v294_v3 = vld [vmem:[#allocation5 + $0x2f8] sm:$0xff] }
  0x31   :  { %328 = vmatpush.msra.mxu1 %v262_v43  ;;  %352 = vmatpush.msra.mxu2 %v212_v44  ;;  %v509_v4 = vld [vmem:[#allocation7 + $0x260] sm:$0xff]  ;;  %v504_v7 = vld [vmem:[#allocation7 + $0x238] sm:$0xff]  ;;  %v240_v8 = vld [vmem:[#allocation5 + $0x148] sm:$0xff] }
  0x32   :  { %375 = vmatpush.msra.mxu3 %v260_v45  ;;  %306 = vmatpush.msra.mxu0 %v211_v46  ;;  %v243_v5 = vld [vmem:[#allocation5 + $0x160] sm:$0xff]  ;;  %v288_v9 = vld [vmem:[#allocation5 + $0x2c8] sm:$0xff]  ;;  %v1659_v10 = vld [vmem:[%s1894_s0 + $0x10] sm:$0xff] }
  0x33   :  { %329 = vmatpush.msra.mxu1 %v259_v47  ;;  %353 = vmatpush.msra.mxu2 %v209_v48  ;;  %v291_v6 = vld [vmem:[#allocation5 + $0x2e0] sm:$0xff]  ;;  %v1664_v11 = vld [vmem:[%s1894_s0 + $0x18] sm:$0xff]  ;;  %v237_v12 = vld [vmem:[#allocation5 + $0x130] sm:$0xff] }
  0x34   :  { %376 = vmatpush.msra.mxu3 %v257_v49  ;;  %307 = vmatpush.msra.mxu0 %v208_v50  ;;  %v285_v13 = vld [vmem:[#allocation5 + $0x2b0] sm:$0xff]  ;;  %v234_v14 = vld [vmem:[#allocation5 + $0x118] sm:$0xff]  ;;  %v231_v17 = vld [vmem:[#allocation5 + $0x100] sm:$0xff] }
  0x35   :  { %330 = vmatpush.msra.mxu1 %v256_v51  ;;  %354 = vmatpush.msra.mxu2 %v206_v52  ;;  %v282_v15 = vld [vmem:[#allocation5 + $0x298] sm:$0xff]  ;;  %v499_v16 = vld [vmem:[#allocation7 + $0x210] sm:$0xff]  ;;  %v279_v18 = vld [vmem:[#allocation5 + $0x280] sm:$0xff] }
  0x36   :  { %377 = vmatpush.msra.mxu3 %v254_v53  ;;  %308 = vmatpush.msra.mxu0 %v205_v54  ;;  %v494_v19 = vld [vmem:[#allocation7 + $0x1e8] sm:$0xff]  ;;  %v489_v22 = vld [vmem:[#allocation7 + $0x1c0] sm:$0xff]  ;;  %v225_v23 = vld [vmem:[#allocation5 + $0xd0] sm:$0xff] }
  0x37   :  { %331 = vmatpush.msra.mxu1 %v253_v55  ;;  %355 = vmatpush.msra.mxu2 %v203_v56  ;;  %v228_v20 = vld [vmem:[#allocation5 + $0xe8] sm:$0xff]  ;;  %v273_v24 = vld [vmem:[#allocation5 + $0x250] sm:$0xff]  ;;  %v484_v25 = vld [vmem:[#allocation7 + $0x198] sm:$0xff] }
  0x38   :  { %378 = vmatpush.msra.mxu3 %v251_v57  ;;  %309 = vmatpush.msra.mxu0 %v202_v58  ;;  %v276_v21 = vld [vmem:[#allocation5 + $0x268] sm:$0xff]  ;;  %v222_v26 = vld [vmem:[#allocation5 + $0xb8] sm:$0xff]  ;;  %v479_v28 = vld [vmem:[#allocation7 + $0x170] sm:$0xff] }
  0x39   :  { %332 = vmatpush.msra.mxu1 %v250_v59  ;;  %356 = vmatpush.msra.mxu2 %v200_v60  ;;  %v270_v27 = vld [vmem:[#allocation5 + $0x238] sm:$0xff]  ;;  %v219_v29 = vld [vmem:[#allocation5 + $0xa0] sm:$0xff]  ;;  %v474_v31 = vld [vmem:[#allocation7 + $0x148] sm:$0xff] }
  0x3a   :  { %379 = vmatpush.msra.mxu3 %v248_v61  ;;  %357 = vmatmul.f32.vlgmr.msra.gmra.mxu2 %v1645_v62  ;;  %v267_v30 = vld [vmem:[#allocation5 + $0x220] sm:$0xff]  ;;  %v216_v32 = vld [vmem:[#allocation5 + $0x88] sm:$0xff]  ;;  %v213_v35 = vld [vmem:[#allocation5 + $0x70] sm:$0xff] }
  0x3b   :  { %380 = vmatmul.f32.vlgmr.msra.gmra.mxu3 %v1650_v63  ;;  %310 = vmatpush.msra.mxu0 %v199_v0  ;;  %v264_v33 = vld [vmem:[#allocation5 + $0x208] sm:$0xff]  ;;  %v469_v34 = vld [vmem:[#allocation7 + $0x120] sm:$0xff]  ;;  %v261_v36 = vld [vmem:[#allocation5 + $0x1f0] sm:$0xff] }
  0x3c   :  { %333 = vmatpush.msra.mxu1 %v247_v1  ;;  %311 = vmatmul.f32.vlgmr.msra.gmra.mxu0 %v1645_v62  ;;  %v464_v37 = vld [vmem:[#allocation7 + $0xf8] sm:$0xff]  ;;  %v459_v40 = vld [vmem:[#allocation7 + $0xd0] sm:$0xff]  ;;  %v207_v41 = vld [vmem:[#allocation5 + $0x40] sm:$0xff] }
  0x3d   :  { %334 = vmatmul.f32.vlgmr.msra.gmra.mxu1 %v1650_v63  ;;  %387 = vmatpush.msrb.mxu0 %v246_v2  ;;  %v210_v38 = vld [vmem:[#allocation5 + $0x58] sm:$0xff]  ;;  %v255_v42 = vld [vmem:[#allocation5 + $0x1c0] sm:$0xff]  ;;  %v454_v43 = vld [vmem:[#allocation7 + $0xa8] sm:$0xff] }
  0x3e   :  { %410 = vmatpush.msrb.mxu1 %v294_v3  ;;  %536 = vmatpush.msrb.mxu3 %v509_v4  ;;  %v258_v39 = vld [vmem:[#allocation5 + $0x1d8] sm:$0xff]  ;;  %v204_v44 = vld [vmem:[#allocation5 + $0x28] sm:$0xff]  ;;  %v449_v46 = vld [vmem:[#allocation7 + $0x80] sm:$0xff] }
  0x3f   :  { %388 = vmatpush.msrb.mxu0 %v243_v5  ;;  %v252_v45 = vld [vmem:[#allocation5 + $0x1a8] sm:$0xff]  ;;  %v201_v47 = vld [vmem:[#allocation5 + $0x10] sm:$0xff]  ;;  %v444_v50 = vld [vmem:[#allocation7 + $0x58] sm:$0xff] }
  0x40   :  { %411 = vmatpush.msrb.mxu1 %v291_v6  ;;  %537 = vmatpush.msrb.mxu3 %v504_v7  ;;  %v249_v48 = vld [vmem:[#allocation5 + $0x190] sm:$0xff]  ;;  %v510_v49 = vld [vmem:[#allocation7 + $0x268] sm:$0xff]  ;;  %v505_v51 = vld [vmem:[#allocation7 + $0x240] sm:$0xff] }
  0x41   :  { %389 = vmatpush.msrb.mxu0 %v240_v8  ;;  %v511_v52 = vld [vmem:[#allocation7 + $0x270] sm:$0xff]  ;;  %v500_v54 = vld [vmem:[#allocation7 + $0x218] sm:$0xff]  ;;  %v506_v55 = vld [vmem:[#allocation7 + $0x248] sm:$0xff] }
  0x42   :  { %412 = vmatpush.msrb.mxu1 %v288_v9  ;;  %360 = vmatmul.f32.gmra.mxu2 %v1659_v10  ;;  %v439_v53 = vld [vmem:[#allocation7 + $0x30] sm:$0xff]  ;;  %v434_v56 = vld [vmem:[#allocation7 + $0x8] sm:$0xff]  ;;  %v501_v58 = vld [vmem:[#allocation7 + $0x220] sm:$0xff] }
  0x43   :  { %383 = vmatmul.f32.gmra.mxu3 %v1664_v11  ;;  %390 = vmatpush.msrb.mxu0 %v237_v12  ;;  %v495_v57 = vld [vmem:[#allocation7 + $0x1f0] sm:$0xff]  ;;  %v490_v59 = vld [vmem:[#allocation7 + $0x1c8] sm:$0xff]  ;;  %v485_v60 = vld [vmem:[#allocation7 + $0x1a0] sm:$0xff] }
  0x44   :  { %413 = vmatpush.msrb.mxu1 %v285_v13  ;;  %314 = vmatmul.f32.gmra.mxu0 %v1659_v10  ;;  %v480_v61 = vld [vmem:[#allocation7 + $0x178] sm:$0xff]  ;;  %v470_v0 = vld [vmem:[#allocation7 + $0x128] sm:$0xff]  ;;  %v465_v1 = vld [vmem:[#allocation7 + $0x100] sm:$0xff] }
  0x45   :  { %337 = vmatmul.f32.gmra.mxu1 %v1664_v11  ;;  %391 = vmatpush.msrb.mxu0 %v234_v14  ;;  %v460_v2 = vld [vmem:[#allocation7 + $0xd8] sm:$0xff]  ;;  %v455_v3 = vld [vmem:[#allocation7 + $0xb0] sm:$0xff]  ;;  %v450_v4 = vld [vmem:[#allocation7 + $0x88] sm:$0xff] }
  0x46   :  { %414 = vmatpush.msrb.mxu1 %v282_v15  ;;  %538 = vmatpush.msrb.mxu3 %v499_v16  ;;  %v445_v5 = vld [vmem:[#allocation7 + $0x60] sm:$0xff]  ;;  %v440_v6 = vld [vmem:[#allocation7 + $0x38] sm:$0xff]  ;;  %v435_v7 = vld [vmem:[#allocation7 + $0x10] sm:$0xff] }
  0x47   :  { %392 = vmatpush.msrb.mxu0 %v231_v17  ;;  %v496_v8 = vld [vmem:[#allocation7 + $0x1f8] sm:$0xff]  ;;  %v491_v9 = vld [vmem:[#allocation7 + $0x1d0] sm:$0xff]  ;;  %v486_v12 = vld [vmem:[#allocation7 + $0x1a8] sm:$0xff] }
  0x48   :  { %415 = vmatpush.msrb.mxu1 %v279_v18  ;;  %539 = vmatpush.msrb.mxu3 %v494_v19  ;;  %v481_v13 = vld [vmem:[#allocation7 + $0x180] sm:$0xff]  ;;  %v476_v14 = vld [vmem:[#allocation7 + $0x158] sm:$0xff]  ;;  %v471_v15 = vld [vmem:[#allocation7 + $0x130] sm:$0xff] }
  0x49   :  { %393 = vmatpush.msrb.mxu0 %v228_v20  ;;  %v466_v16 = vld [vmem:[#allocation7 + $0x108] sm:$0xff]  ;;  %v461_v17 = vld [vmem:[#allocation7 + $0xe0] sm:$0xff]  ;;  %v456_v18 = vld [vmem:[#allocation7 + $0xb8] sm:$0xff] }
  0x4a   :  { %416 = vmatpush.msrb.mxu1 %v276_v21  ;;  %540 = vmatpush.msrb.mxu3 %v489_v22  ;;  %v451_v19 = vld [vmem:[#allocation7 + $0x90] sm:$0xff]  ;;  %v446_v20 = vld [vmem:[#allocation7 + $0x68] sm:$0xff]  ;;  %v441_v21 = vld [vmem:[#allocation7 + $0x40] sm:$0xff] }
  0x4b   :  { %394 = vmatpush.msrb.mxu0 %v225_v23  ;;  %v436_v22 = vld [vmem:[#allocation7 + $0x18] sm:$0xff]  ;;  %v1678_v23 = vld [vmem:[#allocation2] sm:$0xff] }
  0x4c   :  { %417 = vmatpush.msrb.mxu1 %v273_v24  ;;  %541 = vmatpush.msrb.mxu3 %v484_v25 }
  0x4d   :  { %395 = vmatpush.msrb.mxu0 %v222_v26  ;;  %v1681_v26 = vld [vmem:[#allocation2 + $0x8] sm:$0xff] }
  0x4e   :  { %418 = vmatpush.msrb.mxu1 %v270_v27  ;;  %542 = vmatpush.msrb.mxu3 %v479_v28 }
  0x4f   :  { %396 = vmatpush.msrb.mxu0 %v219_v29  ;;  %v1684_v29 = vld [vmem:[#allocation8 + $0x1f8] sm:$0xff] }
  0x50   :  { %419 = vmatpush.msrb.mxu1 %v267_v30  ;;  %543 = vmatpush.msrb.mxu3 %v474_v31  ;;  %v1687_v30 = vld [vmem:[#allocation8 + $0x1d8] sm:$0xff] }
  0x51   :  { %397 = vmatpush.msrb.mxu0 %v216_v32  ;;  %v1689_v31 = vld [vmem:[#allocation8 + $0x1b8] sm:$0xff] }
  0x52   :  { %420 = vmatpush.msrb.mxu1 %v264_v33  ;;  %544 = vmatpush.msrb.mxu3 %v469_v34 }
  0x53   :  { %398 = vmatpush.msrb.mxu0 %v213_v35  ;;  %v1692_v35 = vld [vmem:[#allocation8 + $0x198] sm:$0xff] }
  0x54   :  { %421 = vmatpush.msrb.mxu1 %v261_v36  ;;  %545 = vmatpush.msrb.mxu3 %v464_v37  ;;  %v1694_v37 = vld [vmem:[#allocation2 + $0x10] sm:$0xff] }
  0x55   :  { %399 = vmatpush.msrb.mxu0 %v210_v38  ;;  %v1697_v38 = vld [vmem:[#allocation8 + $0x178] sm:$0xff] }
  0x56   :  { %422 = vmatpush.msrb.mxu1 %v258_v39  ;;  %546 = vmatpush.msrb.mxu3 %v459_v40 }
  0x57   :  { %400 = vmatpush.msrb.mxu0 %v207_v41 }
  0x58   :  { %423 = vmatpush.msrb.mxu1 %v255_v42  ;;  %547 = vmatpush.msrb.mxu3 %v454_v43  ;;  %v1703_v42 = vld [vmem:[%s1896_s2 + $0x10] sm:$0xff]  ;;  %v1706_v43 = vld [vmem:[#allocation8 + $0x158] sm:$0xff] }
  0x59   :  { %401 = vmatpush.msrb.mxu0 %v204_v44 }
  0x5a   :  { %424 = vmatpush.msrb.mxu1 %v252_v45  ;;  %548 = vmatpush.msrb.mxu3 %v449_v46  ;;  %v1709_v46 = vld [vmem:[#allocation8 + $0x138] sm:$0xff] }
  0x5b   :  { %402 = vmatpush.msrb.mxu0 %v201_v47 }
  0x5c   :  { %425 = vmatpush.msrb.mxu1 %v249_v48  ;;  %403 = vmatmul.f32.vlgmr.msrb.gmra.mxu0 %v1645_v62  ;;  %v475_v62 = vld [vmem:[#allocation7 + $0x150] sm:$0xff]  ;;  %v1717_v48 = vld [vmem:[%s1896_s2] sm:$0xff] }
  0x5d   :  { %559 = vmatpush.msra.mxu0 %v510_v49  ;;  %426 = vmatmul.f32.vlgmr.msrb.gmra.mxu1 %v1650_v63  ;;  %v1719_v49 = vld [vmem:[#allocation8 + $0x118] sm:$0xff] }
  0x5e   :  { %549 = vmatpush.msrb.mxu3 %v444_v50  ;;  %582 = vmatpush.msra.mxu1 %v511_v52  ;;  %v1721_v50 = vld [vmem:[#allocation2 + $0x18] sm:$0xff] }
  0x5f   :  { %560 = vmatpush.msra.mxu0 %v505_v51  ;;  %v1724_v51 = vld [vmem:[#allocation8 + $0xf8] sm:$0xff] }
  0x60   :  { %550 = vmatpush.msrb.mxu3 %v439_v53  ;;  %583 = vmatpush.msra.mxu1 %v506_v55  ;;  %v1730_v52 = vld [vmem:[#allocation8 + $0xd8] sm:$0xff] }
  0x61   :  { %561 = vmatpush.msra.mxu0 %v500_v54  ;;  %v1733_v53 = vld [vmem:[#allocation8 + $0xb8] sm:$0xff] }
  0x62   :  { %551 = vmatpush.msrb.mxu3 %v434_v56  ;;  %584 = vmatpush.msra.mxu1 %v501_v58  ;;  %v1736_v54 = vld [vmem:[#allocation8 + $0x98] sm:$0xff] }
  0x63   :  { %562 = vmatpush.msra.mxu0 %v495_v57  ;;  %552 = vmatmul.f32.vlgmr.msrb.gmra.mxu3 %v1650_v63  ;;  %v1739_v55 = vld [vmem:[#allocation8 + $0x78] sm:$0xff] }
  0x64   :  { %406 = vmatmul.f32.gmra.mxu0 %v1659_v10  ;;  %585 = vmatpush.msra.mxu1 %v496_v8  ;;  %v1745_v56 = vld [vmem:[%s1896_s2 + $0x18] sm:$0xff] }
  0x65   :  { %563 = vmatpush.msra.mxu0 %v490_v59  ;;  %429 = vmatmul.f32.gmra.mxu1 %v1664_v11  ;;  %v1747_v57 = vld [vmem:[#allocation8 + $0x58] sm:$0xff]  ;;  %v1758_v59 = vld [vmem:[%s1896_s2 + $0x8] sm:$0xff] }
  0x66   :  { %586 = vmatpush.msra.mxu1 %v491_v9  ;;  %v1750_v58 = vld [vmem:[#allocation8 + $0x38] sm:$0xff]  ;;  %v176_v9 = vld [vmem:[#allocation8 + $0x150] sm:$0xff] }
  0x67   :  { %564 = vmatpush.msra.mxu0 %v485_v60 }
  0x68   :  { %587 = vmatpush.msra.mxu1 %v486_v12 }
  0x69   :  { %565 = vmatpush.msra.mxu0 %v480_v61  ;;  %v1760_v61 = vld [vmem:[#allocation8 + $0x18] sm:$0xff] }
  0x6a   :  { %588 = vmatpush.msra.mxu1 %v481_v13  ;;  %v172_v13 = vld [vmem:[#allocation8 + $0x130] sm:$0xff] }
  0x6b   :  { %566 = vmatpush.msra.mxu0 %v475_v62  ;;  %555 = vmatmul.f32.gmra.mxu3 %v1664_v11 }
  0x6c   :  { %589 = vmatpush.msra.mxu1 %v476_v14  ;;  %v168_v14 = vld [vmem:[#allocation8 + $0x110] sm:$0xff] }
  0x6d   :  { %567 = vmatpush.msra.mxu0 %v470_v0  ;;  %v196_v0 = vld [vmem:[#allocation8 + $0x1f0] sm:$0xff] }
  0x6e   :  { %590 = vmatpush.msra.mxu1 %v471_v15  ;;  %v164_v15 = vld [vmem:[#allocation8 + $0xf0] sm:$0xff] }
  0x6f   :  { %568 = vmatpush.msra.mxu0 %v465_v1  ;;  %v192_v1 = vld [vmem:[#allocation8 + $0x1d0] sm:$0xff] }
  0x70   :  { %591 = vmatpush.msra.mxu1 %v466_v16  ;;  %v160_v16 = vld [vmem:[#allocation8 + $0xd0] sm:$0xff] }
  0x71   :  { %569 = vmatpush.msra.mxu0 %v460_v2  ;;  %v188_v2 = vld [vmem:[#allocation8 + $0x1b0] sm:$0xff] }
  0x72   :  { %592 = vmatpush.msra.mxu1 %v461_v17  ;;  %v156_v17 = vld [vmem:[#allocation8 + $0xb0] sm:$0xff] }
  0x73   :  { %570 = vmatpush.msra.mxu0 %v455_v3  ;;  %v184_v3 = vld [vmem:[#allocation8 + $0x190] sm:$0xff] }
  0x74   :  { %593 = vmatpush.msra.mxu1 %v456_v18  ;;  %v152_v18 = vld [vmem:[#allocation8 + $0x90] sm:$0xff] }
  0x75   :  { %571 = vmatpush.msra.mxu0 %v450_v4 }
  0x76   :  { %594 = vmatpush.msra.mxu1 %v451_v19  ;;  %v148_v19 = vld [vmem:[#allocation8 + $0x70] sm:$0xff] }
  0x77   :  { %572 = vmatpush.msra.mxu0 %v445_v5 }
  0x78   :  { %595 = vmatpush.msra.mxu1 %v446_v20  ;;  %v144_v20 = vld [vmem:[#allocation8 + $0x50] sm:$0xff] }
  0x79   :  { %573 = vmatpush.msra.mxu0 %v440_v6 }
  0x7a   :  { %596 = vmatpush.msra.mxu1 %v441_v21  ;;  %v140_v21 = vld [vmem:[#allocation8 + $0x30] sm:$0xff] }
  0x7b   :  { %574 = vmatpush.msra.mxu0 %v435_v7  ;;  %v180_v7 = vld [vmem:[#allocation8 + $0x170] sm:$0xff] }
  0x7c   :  { %575 = vmatmul.f32.vlgmr.msra.gmra.mxu0 %v1650_v63  ;;  %597 = vmatpush.msra.mxu1 %v436_v22  ;;  %v136_v22 = vld [vmem:[#allocation8 + $0x10] sm:$0xff] }
  0x7d   :  { %598 = vmatmul.f32.vlgmr.msra.gmra.mxu1 %v1678_v23 }
  0x7e   :  { %741 = vmatpush.msrb.mxu1 %v1684_v29 }
  0x80   :  { %742 = vmatpush.msrb.mxu1 %v1687_v30 }
  0x82   :  { %743 = vmatpush.msrb.mxu1 %v1689_v31 }
  0x84   :  { %578 = vmatmul.f32.gmra.mxu0 %v1664_v11  ;;  %744 = vmatpush.msrb.mxu1 %v1692_v35 }
  0x85   :  { %601 = vmatmul.f32.gmra.mxu1 %v1681_v26 }
  0x86   :  { %745 = vmatpush.msrb.mxu1 %v1697_v38 }
  0x88   :  { %746 = vmatpush.msrb.mxu1 %v1706_v43 }
  0x8a   :  { %747 = vmatpush.msrb.mxu1 %v1709_v46 }
  0x8c   :  { %748 = vmatpush.msrb.mxu1 %v1719_v49 }
  0x8d   :  { %604 = vmatmul.f32.gmra.mxu1 %v1694_v37 }
  0x8e   :  { %749 = vmatpush.msrb.mxu1 %v1724_v51 }
  0x90   :  { %750 = vmatpush.msrb.mxu1 %v1730_v52 }
  0x92   :  { %751 = vmatpush.msrb.mxu1 %v1733_v53 }
  0x94   :  { %752 = vmatpush.msrb.mxu1 %v1736_v54 }
  0x95   :  { %607 = vmatmul.f32.gmra.mxu1 %v1721_v50 }
  0x96   :  { %753 = vmatpush.msrb.mxu1 %v1739_v55 }
  0x98   :  { %754 = vmatpush.msrb.mxu1 %v1747_v57 }
  0x9a   :  { %755 = vmatpush.msrb.mxu1 %v1750_v58 }
  0x9c   :  { %756 = vmatpush.msrb.mxu1 %v1760_v61 }
  0x9e   :  { %914 = vmatpush.msra.mxu1 %v196_v0 }
  0xa0   :  { %915 = vmatpush.msra.mxu1 %v192_v1  ;;  %v483_v1 = vld [vmem:[#allocation7 + $0x190] sm:$0xff] }
  0xa2   :  { %916 = vmatpush.msra.mxu1 %v188_v2  ;;  %v478_v2 = vld [vmem:[#allocation7 + $0x168] sm:$0xff] }
  0xa4   :  { %917 = vmatpush.msra.mxu1 %v184_v3 }
  0xa6   :  { %918 = vmatpush.msra.mxu1 %v180_v7  ;;  %v468_v7 = vld [vmem:[#allocation7 + $0x118] sm:$0xff] }
  0xa8   :  { %919 = vmatpush.msra.mxu1 %v176_v9  ;;  %v463_v9 = vld [vmem:[#allocation7 + $0xf0] sm:$0xff] }
  0xaa   :  { %920 = vmatpush.msra.mxu1 %v172_v13  ;;  %v458_v13 = vld [vmem:[#allocation7 + $0xc8] sm:$0xff] }
  0xac   :  { %921 = vmatpush.msra.mxu1 %v168_v14 }
  0xae   :  { %922 = vmatpush.msra.mxu1 %v164_v15 }
  0xb0   :  { %923 = vmatpush.msra.mxu1 %v160_v16  ;;  %v453_v16 = vld [vmem:[#allocation7 + $0xa0] sm:$0xff] }
  0xb2   :  { %924 = vmatpush.msra.mxu1 %v156_v17 }
  0xb4   :  { %925 = vmatpush.msra.mxu1 %v152_v18  ;;  %v448_v18 = vld [vmem:[#allocation7 + $0x78] sm:$0xff] }
  0xb6   :  { %926 = vmatpush.msra.mxu1 %v148_v19  ;;  %v443_v19 = vld [vmem:[#allocation7 + $0x50] sm:$0xff] }
  0xb8   :  { %927 = vmatpush.msra.mxu1 %v144_v20 }
  0xb9   :  { %v312_v24 = vpop.f32.mrf.mxu0 }
  0xba   :  { %v335_v25 = vpop.f32.mrf.mxu1  ;;  %928 = vmatpush.msra.mxu1 %v140_v21  ;;  %v438_v21 = vld [vmem:[#allocation7 + $0x28] sm:$0xff] }
  0xbb   :  { %v336_v32 = vadd.f32 %v335_v25, %v312_v24 }
  0xbc   :  { %929 = vmatpush.msra.mxu1 %v136_v22 }
  0xbd   :  { %v358_v27 = vpop.f32.mrf.mxu2 }
  0xbe   :  { %v381_v28 = vpop.f32.mrf.mxu3 }
  0xbf   :  { %v382_v44 = vadd.f32 %v381_v28, %v358_v27 }
  0xc1   :  { %v315_v33 = vpop.f32.mrf.mxu0 }
  0xc2   :  { %v338_v34 = vpop.f32.mrf.mxu1 }
  0xc3   :  { %v339_v36 = vadd.f32 %v338_v34, %v315_v33  ;;  %v508_v34 = vld [vmem:[#allocation7 + $0x258] sm:$0xff] }
  0xc4   :  { %513 = vmatpush.msrb.mxu2 %v508_v34 }
  0xc5   :  { %v677_v39 = vpack.c.bf16 %v339_v36, %v336_v32  ;;  %v361_v40 = vpop.f32.mrf.mxu2  ;;  %v503_v36 = vld [vmem:[#allocation7 + $0x230] sm:$0xff] }
  0xc6   :  { %v384_v41 = vpop.f32.mrf.mxu3  ;;  %514 = vmatpush.msrb.mxu2 %v503_v36  ;;  %v507_v36 = vld [vmem:[#allocation7 + $0x250] sm:$0xff] }
  0xc7   :  { %v385_v45 = vadd.f32 %v384_v41, %v361_v40  ;;  %701 = vmatpush.bf16.msrb.mxu0 %v677_v39  ;;  %v498_v39 = vld [vmem:[#allocation7 + $0x208] sm:$0xff] }
  0xc8   :  { %515 = vmatpush.msrb.mxu2 %v498_v39  ;;  %v502_v39 = vld [vmem:[#allocation7 + $0x228] sm:$0xff] }
  0xc9   :  { %v640_v47 = vpack.c.bf16 %v385_v45, %v382_v44  ;;  %v493_v44 = vld [vmem:[#allocation7 + $0x1e0] sm:$0xff] }
  0xca   :  { %1272 = vmatmul.msk.bf16.vlgmr.msrb.gmra.mxu0 %vm651_vm0, %v1703_v42  ;;  %516 = vmatpush.msrb.mxu2 %v493_v44  ;;  %v487_v44 = vld [vmem:[#allocation7 + $0x1b0] sm:$0xff] }
  0xcb   :  { %665 = vmatpush.bf16.msra.mxu3 %v640_v47 }
  0xce   :  { %1262 = vmatmul.msk.bf16.vlgmr.msra.gmra.mxu3 %vm651_vm0, %v1717_v48 }
  0xd9   :  { %v404_v62 = vpop.f32.mrf.mxu0 }
  0xda   :  { %1273 = vmatmul.msk.bf16.gmra.mxu0 %vm651_vm0, %v1745_v56  ;;  %v427_v60 = vpop.f32.mrf.mxu1 }
  0xdb   :  { %v428_v4 = vadd.f32 %v427_v60, %v404_v62  ;;  %v488_v60 = vld [vmem:[#allocation7 + $0x1b8] sm:$0xff] }
  0xdc   :  { %517 = vmatpush.msrb.mxu2 %v488_v60  ;;  %v472_v60 = vld [vmem:[#allocation7 + $0x138] sm:$0xff] }
  0xde   :  { %1263 = vmatmul.msk.bf16.gmra.mxu3 %vm651_vm0, %v1758_v59  ;;  %518 = vmatpush.msrb.mxu2 %v483_v1  ;;  %v452_v1 = vld [vmem:[#allocation7 + $0x98] sm:$0xff] }
  0xe0   :  { %519 = vmatpush.msrb.mxu2 %v478_v2  ;;  %v447_v2 = vld [vmem:[#allocation7 + $0x70] sm:$0xff] }
  0xe1   :  { %v407_v6 = vpop.f32.mrf.mxu0 }
  0xe2   :  { %v430_v5 = vpop.f32.mrf.mxu1 }
  0xe3   :  { %v431_v8 = vadd.f32 %v430_v5, %v407_v6  ;;  %v473_v5 = vld [vmem:[#allocation7 + $0x140] sm:$0xff] }
  0xe4   :  { %520 = vmatpush.msrb.mxu2 %v473_v5 }
  0xe5   :  { %v713_v12 = vpack.c.bf16 %v431_v8, %v428_v4 }
  0xe6   :  { %v1770_v25 = vpop.f32.mrf.mxu3  ;;  %521 = vmatpush.msrb.mxu2 %v468_v7 }
  0xe7   :  { %721 = vmatpush.bf16.msrb.mxu3 %v713_v12 }
  0xe8   :  { %522 = vmatpush.msrb.mxu2 %v463_v9  ;;  %v190_v9 = vld [vmem:[#allocation8 + $0x1c0] sm:$0xff] }
  0xea   :  { %523 = vmatpush.msrb.mxu2 %v458_v13  ;;  %v186_v13 = vld [vmem:[#allocation8 + $0x1a0] sm:$0xff] }
  0xec   :  { %524 = vmatpush.msrb.mxu2 %v453_v16 }
  0xee   :  { %1274 = vmatmul.msk.bf16.vlgmr.msrb.gmra.mxu3 %vm651_vm0, %v1717_v48  ;;  %v1772_v28 = vpop.f32.mrf.mxu3  ;;  %525 = vmatpush.msrb.mxu2 %v448_v18  ;;  %v174_v18 = vld [vmem:[#allocation8 + $0x140] sm:$0xff] }
  0xf0   :  { %526 = vmatpush.msrb.mxu2 %v443_v19 }
  0xf2   :  { %527 = vmatpush.msrb.mxu2 %v438_v21  ;;  %v170_v21 = vld [vmem:[#allocation8 + $0x120] sm:$0xff] }
  0xf9   :  { %v576_v24 = vpop.f32.mrf.mxu0 }
  0xfa   :  { %v599_v32 = vpop.f32.mrf.mxu1 }
  0xfe   :  { %1275 = vmatmul.msk.bf16.gmra.mxu3 %vm651_vm0, %v1758_v59 }
 0x101   :  { %v579_v27 = vpop.f32.mrf.mxu0 }
 0x102   :  { %v602_v47 = vpop.f32.mrf.mxu1  ;;  %v1062_v62 = vpack.c.bf16 %v579_v27, %v576_v24 }
 0x10a   :  { %v605_v8 = vpop.f32.mrf.mxu1 }
 0x112   :  { %v608_v20 = vpop.f32.mrf.mxu1 }
 0x147   :  { %v703_v33 = vpop.f32.mrf.mxu0 }
 0x14f   :  { %v705_v0 = vpop.f32.mrf.mxu0 }
 0x151   :  { %v667_v40 = vpop.f32.mrf.mxu3 }
 0x152   :  { %v733_v41 = vmul.f32 %v703_v33, %v667_v40  ;;  %v512_v33 = vld [vmem:[#allocation7 + $0x278] sm:$0xff]  ;;  %v497_v40 = vld [vmem:[#allocation7 + $0x200] sm:$0xff] }
 0x154   :  { %v737_v45 = vmul.f32 %v733_v41, %v599_v32  ;;  %v433_v32 = vld [vmem:[#allocation7] sm:$0xff]  ;;  %v492_v41 = vld [vmem:[#allocation7 + $0x1d8] sm:$0xff] }
 0x155   :  { %528 = vmatpush.msrb.mxu2 %v433_v32  ;;  %v162_v32 = vld [vmem:[#allocation8 + $0xe0] sm:$0xff] }
 0x156   :  { %757 = vmatmul.f32.vlgmr.msrb.gmra.mxu1 %v737_v45  ;;  %529 = vmatmul.f32.vlgmr.msrb.gmra.mxu2 %v1650_v63  ;;  %v482_v45 = vld [vmem:[#allocation7 + $0x188] sm:$0xff]  ;;  %v457_v63 = vld [vmem:[#allocation7 + $0xc0] sm:$0xff] }
 0x157   :  { %1070 = vmatpush.bf16.msrb.mxu1 %v1062_v62  ;;  %v708_v12 = vpop.f32.mrf.mxu0  ;;  %611 = vmatpush.msra.mxu2 %v512_v33  ;;  %v467_v62 = vld [vmem:[#allocation7 + $0x110] sm:$0xff]  ;;  %v158_v33 = vld [vmem:[#allocation8 + $0xc0] sm:$0xff] }
 0x159   :  { %v669_v3 = vpop.f32.mrf.mxu3  ;;  %612 = vmatpush.msra.mxu2 %v507_v36 }
 0x15a   :  { %v734_v4 = vmul.f32 %v705_v0, %v669_v3  ;;  %v462_v0 = vld [vmem:[#allocation7 + $0xe8] sm:$0xff] }
 0x15b   :  { %613 = vmatpush.msra.mxu2 %v502_v39  ;;  %v442_v3 = vld [vmem:[#allocation7 + $0x48] sm:$0xff]  ;;  %v154_v39 = vld [vmem:[#allocation8 + $0xa0] sm:$0xff] }
 0x15c   :  { %v738_v6 = vmul.f32 %v734_v4, %v602_v47  ;;  %v477_v47 = vld [vmem:[#allocation7 + $0x160] sm:$0xff] }
 0x15d   :  { %614 = vmatpush.msra.mxu2 %v497_v40 }
 0x15e   :  { %760 = vmatmul.f32.gmra.mxu1 %v738_v6  ;;  %532 = vmatmul.f32.gmra.mxu2 %v1664_v11  ;;  %v437_v11 = vld [vmem:[#allocation7 + $0x20] sm:$0xff] }
 0x15f   :  { %v710_v22 = vpop.f32.mrf.mxu0  ;;  %615 = vmatpush.msra.mxu2 %v492_v41 }
 0x161   :  { %v672_v14 = vpop.f32.mrf.mxu3  ;;  %616 = vmatpush.msra.mxu2 %v487_v44  ;;  %v150_v44 = vld [vmem:[#allocation8 + $0x80] sm:$0xff] }
 0x162   :  { %v735_v15 = vmul.f32 %v708_v12, %v672_v14 }
 0x163   :  { %617 = vmatpush.msra.mxu2 %v482_v45 }
 0x164   :  { %v739_v17 = vmul.f32 %v735_v15, %v605_v8  ;;  %v194_v8 = vld [vmem:[#allocation8 + $0x1e0] sm:$0xff] }
 0x165   :  { %618 = vmatpush.msra.mxu2 %v477_v47  ;;  %842 = vmatpush.msra.mxu3 %v194_v8  ;;  %v182_v15 = vld [vmem:[#allocation8 + $0x180] sm:$0xff] }
 0x166   :  { %763 = vmatmul.f32.gmra.mxu1 %v739_v17 }
 0x167   :  { %619 = vmatpush.msra.mxu2 %v472_v60  ;;  %843 = vmatpush.msra.mxu3 %v190_v9  ;;  %v134_v9 = vld [vmem:[#allocation8] sm:$0xff] }
 0x169   :  { %v674_v24 = vpop.f32.mrf.mxu3  ;;  %620 = vmatpush.msra.mxu2 %v467_v62  ;;  %844 = vmatpush.msra.mxu3 %v186_v13 }
 0x16a   :  { %v736_v27 = vmul.f32 %v710_v22, %v674_v24 }
 0x16b   :  { %621 = vmatpush.msra.mxu2 %v462_v0  ;;  %845 = vmatpush.msra.mxu3 %v182_v15  ;;  %v146_v0 = vld [vmem:[#allocation8 + $0x60] sm:$0xff] }
 0x16c   :  { %v740_v34 = vmul.f32 %v736_v27, %v608_v20  ;;  %v166_v27 = vld [vmem:[#allocation8 + $0x100] sm:$0xff] }
 0x16d   :  { %622 = vmatpush.msra.mxu2 %v457_v63 }
 0x16e   :  { %766 = vmatmul.f32.gmra.mxu1 %v740_v34 }
 0x16f   :  { %623 = vmatpush.msra.mxu2 %v452_v1 }
 0x171   :  { %624 = vmatpush.msra.mxu2 %v447_v2  ;;  %v723_v5 = vpop.f32.mrf.mxu3  ;;  %v142_v2 = vld [vmem:[#allocation8 + $0x40] sm:$0xff] }
 0x173   :  { %625 = vmatpush.msra.mxu2 %v442_v3 }
 0x175   :  { %626 = vmatpush.msra.mxu2 %v437_v11 }
 0x176   :  { %627 = vmatmul.f32.vlgmr.msra.gmra.mxu2 %v1678_v23  ;;  %v178_v23 = vld [vmem:[#allocation8 + $0x160] sm:$0xff] }
 0x177   :  { %846 = vmatpush.msra.mxu3 %v178_v23 }
 0x179   :  { %v725_v7 = vpop.f32.mrf.mxu3  ;;  %847 = vmatpush.msra.mxu3 %v174_v18 }
 0x17b   :  { %848 = vmatpush.msra.mxu3 %v170_v21 }
 0x17d   :  { %849 = vmatpush.msra.mxu3 %v166_v27 }
 0x17e   :  { %630 = vmatmul.f32.gmra.mxu2 %v1681_v26 }
 0x17f   :  { %850 = vmatpush.msra.mxu3 %v162_v32 }
 0x181   :  { %851 = vmatpush.msra.mxu3 %v158_v33 }
 0x183   :  { %852 = vmatpush.msra.mxu3 %v154_v39  ;;  %v1822_v39 = vld [vmem:[%s1902_s8] sm:$0xff] }
 0x185   :  { %853 = vmatpush.msra.mxu3 %v150_v44 }
 0x186   :  { %633 = vmatmul.f32.gmra.mxu2 %v1694_v37  ;;  %v728_v37 = vpop.f32.mrf.mxu3 }
 0x187   :  { %854 = vmatpush.msra.mxu3 %v146_v0 }
 0x189   :  { %855 = vmatpush.msra.mxu3 %v142_v2 }
 0x18e   :  { %636 = vmatmul.f32.gmra.mxu2 %v1721_v50  ;;  %v730_v36 = vpop.f32.mrf.mxu3 }
 0x1d3   :  { %v758_v4 = vpop.f32.mrf.mxu1 }
 0x1d4   :  { %v1276_v26 = vclamps-f32 %v758_v4, 5.0  ;;  %v1022_v4 = vpack.c.bf16 %v1772_v28, %v1770_v25 }
 0x1d6   :  { %v778_v22 = vmul.f32 1.442695, %v1276_v26 }
 0x1d9   :  { %v530_v25 = vpop.f32.mrf.mxu2 }
 0x1db   :  { %v761_v6 = vpop.f32.mrf.mxu1 }
 0x1dc   :  { %v1277_v16 = vclamps-f32 %v761_v6, 5.0  ;;  %v1785_v6 = vld [vmem:[%s1897_s3] sm:$0xff] }
 0x1de   :  { %v780_v19 = vmul.f32 1.442695, %v1277_v16 }
 0x1e1   :  { %v533_v28 = vpop.f32.mrf.mxu2 }
 0x1e3   :  { %v764_v12 = vpop.f32.mrf.mxu1 }
 0x1e4   :  { %v1278_v14 = vclamps-f32 %v764_v12, 5.0 }
 0x1e6   :  { %v782_v17 = vmul.f32 1.442695, %v1278_v14 }
 0x1e8   :  { %1335 = vpow2.f32 %v782_v17 }
 0x1e9   :  { %1337 = vpow2.f32 %v780_v19 }
 0x1eb   :  { %v767_v20 = vpop.f32.mrf.mxu1 }
 0x1ec   :  { %v1279_v50 = vclamps-f32 %v767_v20, 5.0 }
 0x1ee   :  { %v784_v24 = vmul.f32 1.442695, %v1279_v50  ;;  %v1336_v34 = vpop.eup %1335 }
 0x1ef   :  { %v1338_v40 = vpop.eup %1337  ;;  %v788_v45 = vmul.f32 %v1336_v34, %v728_v37 }
 0x1f0   :  { %1339 = vpow2.f32 %v784_v24  ;;  %v787_v63 = vmul.f32 %v1338_v40, %v725_v7  ;;  %v138_v7 = vld [vmem:[#allocation8 + $0x20] sm:$0xff] }
 0x1f1   :  { %1341 = vpow2.f32 %v778_v22  ;;  %856 = vmatpush.msra.mxu3 %v138_v7 }
 0x1f3   :  { %857 = vmatpush.msra.mxu3 %v134_v9 }
 0x1f6   :  { %v1340_v41 = vpop.eup %1339 }
 0x1f7   :  { %v789_v47 = vmul.f32 %v1340_v41, %v730_v36  ;;  %v816_v60 = vpack.c.bf16 %v1340_v41, %v1336_v34  ;;  %v1342_v62 = vpop.eup %1341  ;;  %v1563_v36 = vmov 16.0   ;;  %v841_v41 = vperm.slane %v1822_v39, 0 }
 0x1f8   :  { %v786_v3 = vmul.f32 %v1342_v62, %v723_v5  ;;  %v815_v11 = vpack.c.bf16 %v1338_v40, %v1342_v62  ;;  %v1042_v5 = vpack.c.bf16 %v533_v28, %v530_v25 }
 0x1f9   :  { %v791_v1 = vpack.c.bf16 %v789_v47, %v788_v45  ;;  %823 = vmatpush.bf16.msra.mxu0 %v816_v60  ;;  %v628_v12 = vpop.f32.mrf.mxu2 }
 0x1fa   :  { %v790_v8 = vpack.c.bf16 %v787_v63, %v786_v3  ;;  %1050 = vmatpush.bf16.msrb.mxu3 %v1042_v5 }
 0x1fb   :  { %807 = vmatpush.bf16.msrb.mxu2 %v791_v1 }
 0x1fd   :  { %824 = vmatpush.bf16.msra.mxu0 %v815_v11 }
 0x1ff   :  { %808 = vmatpush.bf16.msrb.mxu2 %v790_v8 }
 0x200   :  { %1285 = vmatmul.msk.bf16.vlgmr.msra.gmra.mxu0 %vm797_vm1, %v1785_v6 }
 0x201   :  { %1030 = vmatpush.bf16.msrb.mxu0 %v1022_v4  ;;  %v631_v13 = vpop.f32.mrf.mxu2 }
 0x202   :  { %1284 = vmatmul.msk.bf16.vlgmr.msrb.gmra.mxu2 %vm797_vm1, %v1785_v6 }
 0x205   :  { %1090 = vmatpush.msra.mxu0 %v1684_v29 }
 0x207   :  { %1091 = vmatpush.msra.mxu0 %v1687_v30 }
 0x209   :  { %1092 = vmatpush.msra.mxu0 %v1689_v31  ;;  %v1811_v14 = vpop.f32.mrf.mxu2 }
 0x20b   :  { %1093 = vmatpush.msra.mxu0 %v1692_v35 }
 0x20d   :  { %1094 = vmatpush.msra.mxu0 %v1697_v38 }
 0x20f   :  { %1095 = vmatpush.msra.mxu0 %v1706_v43 }
 0x210   :  { %1286 = vmatmul.msk.bf16.vlgmr.msrb.gmra.mxu0 %vm651_vm0, %v1717_v48 }
 0x211   :  { %1096 = vmatpush.msra.mxu0 %v1709_v46  ;;  %v1813_v23 = vpop.f32.mrf.mxu2 }
 0x213   :  { %1097 = vmatpush.msra.mxu0 %v1719_v49 }
 0x215   :  { %1098 = vmatpush.msra.mxu0 %v1724_v51 }
 0x217   :  { %1099 = vmatpush.msra.mxu0 %v1730_v52 }
 0x219   :  { %1100 = vmatpush.msra.mxu0 %v1733_v53 }
 0x21b   :  { %1101 = vmatpush.msra.mxu0 %v1736_v54 }
 0x21d   :  { %1102 = vmatpush.msra.mxu0 %v1739_v55 }
 0x21f   :  { %1103 = vmatpush.msra.mxu0 %v1747_v57 }
 0x220   :  { %1287 = vmatmul.msk.bf16.gmra.mxu0 %vm651_vm0, %v1758_v59 }
 0x221   :  { %1104 = vmatpush.msra.mxu0 %v1750_v58 }
 0x223   :  { %1105 = vmatpush.msra.mxu0 %v1760_v61 }
 0x27d   :  { %v826_v15 = vpop.f32.mrf.mxu0 }
 0x27e   :  { %v827_v16 = vadd.f32 1e-06, %v826_v15 }
 0x280   :  { %1343 = vrcp.f32 %v827_v16 }
 0x285   :  { %v828_v26 = vpop.f32.mrf.mxu0  ;;  %v810_v20 = vpop.f32.mrf.mxu2 }
 0x286   :  { %v1344_v17 = vpop.eup %1343  ;;  %v829_v37 = vadd.f32 1e-06, %v828_v26 }
 0x287   :  { %v833_v18 = vmul.f32 %v1344_v17, %v827_v16 }
 0x288   :  { %1345 = vrcp.f32 %v829_v37 }
 0x289   :  { %v835_v19 = vsub.f32 2.0, %v833_v18  ;;  %1347 = vrcp.f32 %v1563_v36 }
 0x28b   :  { %v837_v50 = vmul.f32 %v1344_v17, %v835_v19 }
 0x28d   :  { %v839_v21 = vmul.f32 %v837_v50, %v810_v20  ;;  %v812_v33 = vpop.f32.mrf.mxu2  ;;  %v1032_v0 = vpop.f32.mrf.mxu0 }
 0x28e   :  { %v1346_v22 = vpop.eup %1345 }
 0x28f   :  { %v834_v24 = vmul.f32 %v1346_v22, %v829_v37  ;;  %858 = vmatmul.f32.vlgmr.msra.gmra.mxu3 %v839_v21  ;;  %v1348_v44 = vpop.eup %1347 }
 0x290   :  { %v875_v60 = vmul.f32 16.0, %v1348_v44  ;;  %vm879_vm2 = vweird.f32 %v1348_v44 }
 0x291   :  { %v836_v27 = vsub.f32 2.0, %v834_v24 }
 0x292   :  { %v876_v1 = vsub.f32 1.0, %v875_v60 }
 0x293   :  { %v838_v32 = vmul.f32 %v1346_v22, %v836_v27 }
 0x294   :  { %v877_v11 = vmul.f32 %v1348_v44, %v876_v1 }
 0x295   :  { %v840_v34 = vmul.f32 %v838_v32, %v812_v33  ;;  %v1034_v9 = vpop.f32.mrf.mxu0 }
 0x296   :  { %v878_v7 = vadd.f32 %v1348_v44, %v877_v11 }
 0x297   :  { %861 = vmatmul.f32.gmra.mxu3 %v840_v34 }
 0x298   :  { %v1829_v26 = vsel %vm879_vm2, %v1348_v44, %v878_v7  ;;  %v913_v7 = vperm.slane %v1822_v39, 3 }
 0x29d   :  { %v1037_v21 = vpop.f32.mrf.mxu0 }
 0x29f   :  { %1288 = vmatmul.msk.bf16.vlgmr.msrb.gmra.mxu3 %vm651_vm0, %v1703_v42  ;;  %v1369_v42 = vld [vmem:[%s1894_s0] sm:$0xff] }
 0x2af   :  { %1289 = vmatmul.msk.bf16.gmra.mxu3 %vm651_vm0, %v1745_v56 }
 0x312   :  { %v859_v40 = vpop.f32.mrf.mxu3 }
 0x313   :  { %v860_v45 = vadd.f32 %v859_v40, %v841_v41 }
 0x315   :  { %v865_v56 = vadd.f32 %v1369_v42, %v860_v45 }
 0x31a   :  { %v862_v47 = vpop.f32.mrf.mxu3 }
 0x31b   :  { %v863_v62 = vadd.f32 %v862_v47, %v841_v41 }
 0x31d   :  { %v866_v63 = vadd.f32 %v863_v62, %v1659_v10 }
 0x31f   :  { %v867_v2 = vadd.f32 %v866_v63, %v865_v56 }
 0x321   :  { %v868_v3 = vrot.slane %v867_v2, 4 }
 0x322   :  { %v1052_v4 = vpop.f32.mrf.mxu3 }
 0x323   :  { %v869_v8 = vadd.f32 %v868_v3, %v867_v2  ;;  %v1082_v25 = vmul.f32 %v1052_v4, %v1032_v0  ;;  %v910_v3 = vperm.slane %v1822_v39, 2 }
 0x325   :  { %v870_v28 = vrot.slane %v869_v8, 2  ;;  %v1086_v5 = vmul.f32 %v1082_v25, %v628_v12 }
 0x327   :  { %v871_v15 = vadd.f32 %v870_v28, %v869_v8  ;;  %1106 = vmatmul.f32.vlgmr.msra.gmra.mxu0 %v1086_v5  ;;  %v939_v5 = vld [vmem:[#allocation10] sm:$0xff] }
 0x329   :  { %v872_v16 = vrot.slane %v871_v15, 1 }
 0x32a   :  { %v1054_v17 = vpop.f32.mrf.mxu3 }
 0x32b   :  { %v873_v37 = vadd.f32 %v872_v16, %v871_v15  ;;  %v1083_v10 = vmul.f32 %v1054_v17, %v1034_v9 }
 0x32d   :  { %v881_v18 = vmul.f32 %v1829_v26, %v873_v37  ;;  %v1087_v19 = vmul.f32 %v1083_v10, %v631_v13 }
 0x32f   :  { %v882_v20 = vsub.f32 %v865_v56, %v881_v18  ;;  %v883_v50 = vsub.f32 %v866_v63, %v881_v18  ;;  %1109 = vmatmul.f32.gmra.mxu0 %v1087_v19 }
 0x331   :  { %v884_v22 = vmul.f32 %v882_v20, %v882_v20  ;;  %v885_v12 = vmul.f32 %v883_v50, %v883_v50 }
 0x332   :  { %v1057_v24 = vpop.f32.mrf.mxu3 }
 0x333   :  { %v886_v27 = vadd.f32 %v885_v12, %v884_v22  ;;  %v1084_v32 = vmul.f32 %v1057_v24, %v1037_v21 }
 0x335   :  { %v887_v33 = vrot.slane %v886_v27, 4  ;;  %v1088_v34 = vmul.f32 %v1084_v32, %v1811_v14  ;;  %v907_v14 = vperm.slane %v1822_v39, 1 }
 0x337   :  { %v888_v36 = vadd.f32 %v887_v33, %v886_v27  ;;  %1112 = vmatmul.f32.gmra.mxu0 %v1088_v34 }
 0x339   :  { %v889_v40 = vrot.slane %v888_v36, 2 }
 0x33b   :  { %v890_v41 = vadd.f32 %v889_v40, %v888_v36 }
 0x33d   :  { %v891_v44 = vrot.slane %v890_v41, 1 }
 0x33f   :  { %v892_v45 = vadd.f32 %v891_v44, %v890_v41 }
 0x341   :  { %v893_v13 = vmul.f32 %v892_v45, %v1829_v26 }
 0x343   :  { %v894_v47 = vadd.f32 1e-05, %v893_v13 }
 0x345   :  { %1349 = vrsqrt.f32 %v894_v47  ;;  %vm901_vm4 = vweird.f32 %v894_v47 }
 0x34b   :  { %v1350_v60 = vpop.eup %1349 }
 0x34c   :  { %v896_v62 = vmul.f32 %v1350_v60, %v894_v47  ;;  %vm902_vm3 = vweird.f32 %v1350_v60 }
 0x34d   :  { %vm903_vm5 = vmor %vm901_vm4, %vm902_vm3 }
 0x34e   :  { %v897_v0 = vmul.f32 %v1350_v60, %v896_v62 }
 0x350   :  { %v898_v42 = vmul.f32 0.5, %v897_v0 }
 0x352   :  { %v899_v56 = vsub.f32 1.5, %v898_v42 }
 0x354   :  { %v900_v63 = vmul.f32 %v1350_v60, %v899_v56 }
 0x356   :  { %v904_v1 = vsel %vm903_vm5, %v1350_v60, %v900_v63 }
 0x357   :  { %v905_v2 = vmul.f32 %v904_v1, %v882_v20  ;;  %v906_v8 = vmul.f32 %v904_v1, %v883_v50 }
 0x359   :  { %v908_v11 = vmul.f32 %v907_v14, %v905_v2  ;;  %v909_v25 = vmul.f32 %v907_v14, %v906_v8 }
 0x35b   :  { %v1836_v4 = vadd.f32 %v910_v3, %v908_v11  ;;  %v1842_v28 = vadd.f32 %v910_v3, %v909_v25  ;;  %v955_v11 = vperm.slane %v1822_v39, 4 }
 0x35d   :  { %930 = vmatmul.f32.vlgmr.msra.gmra.mxu1 %v1836_v4 }
 0x35e   :  { %1303 = vmatpush.msra.mxu1 %v1684_v29  ;;  %v1039_v29 = vpop.f32.mrf.mxu0 }
 0x360   :  { %1304 = vmatpush.msra.mxu1 %v1687_v30  ;;  %v1059_v30 = vpop.f32.mrf.mxu3 }
 0x362   :  { %1305 = vmatpush.msra.mxu1 %v1689_v31  ;;  %v1085_v31 = vmul.f32 %v1059_v30, %v1039_v29 }
 0x364   :  { %1306 = vmatpush.msra.mxu1 %v1692_v35  ;;  %v1089_v35 = vmul.f32 %v1085_v31, %v1813_v23  ;;  %v940_v23 = vld [vmem:[#allocation10 + $0x8] sm:$0xff] }
 0x365   :  { %933 = vmatmul.f32.gmra.mxu1 %v1842_v28 }
 0x366   :  { %1307 = vmatpush.msra.mxu1 %v1697_v38  ;;  %v954_v38 = vld [vmem:[#allocation10 + $0x78] sm:$0xff] }
 0x367   :  { %956 = vmatpush.msra.mxu2 %v954_v38 }
 0x368   :  { %1308 = vmatpush.msra.mxu1 %v1706_v43  ;;  %v953_v43 = vld [vmem:[#allocation10 + $0x70] sm:$0xff] }
 0x369   :  { %957 = vmatpush.msra.mxu2 %v953_v43 }
 0x36a   :  { %1309 = vmatpush.msra.mxu1 %v1709_v46  ;;  %v952_v46 = vld [vmem:[#allocation10 + $0x68] sm:$0xff] }
 0x36b   :  { %958 = vmatpush.msra.mxu2 %v952_v46 }
 0x36c   :  { %1310 = vmatpush.msra.mxu1 %v1719_v49  ;;  %v950_v49 = vld [vmem:[#allocation10 + $0x58] sm:$0xff] }
 0x36d   :  { %1290 = vmatmul.msk.bf16.vlgmr.msrb.gmra.mxu1 %vm651_vm0, %v1717_v48  ;;  %v951_v48 = vld [vmem:[#allocation10 + $0x60] sm:$0xff] }
 0x36e   :  { %1311 = vmatpush.msra.mxu1 %v1724_v51  ;;  %959 = vmatpush.msra.mxu2 %v951_v48  ;;  %v949_v51 = vld [vmem:[#allocation10 + $0x50] sm:$0xff] }
 0x370   :  { %1312 = vmatpush.msra.mxu1 %v1730_v52  ;;  %960 = vmatpush.msra.mxu2 %v950_v49  ;;  %v948_v52 = vld [vmem:[#allocation10 + $0x48] sm:$0xff] }
 0x372   :  { %1313 = vmatpush.msra.mxu1 %v1733_v53  ;;  %961 = vmatpush.msra.mxu2 %v949_v51  ;;  %v947_v53 = vld [vmem:[#allocation10 + $0x40] sm:$0xff] }
 0x374   :  { %1314 = vmatpush.msra.mxu1 %v1736_v54  ;;  %962 = vmatpush.msra.mxu2 %v948_v52  ;;  %v946_v54 = vld [vmem:[#allocation10 + $0x38] sm:$0xff] }
 0x376   :  { %1315 = vmatpush.msra.mxu1 %v1739_v55  ;;  %963 = vmatpush.msra.mxu2 %v947_v53  ;;  %v945_v55 = vld [vmem:[#allocation10 + $0x30] sm:$0xff] }
 0x378   :  { %1316 = vmatpush.msra.mxu1 %v1747_v57  ;;  %964 = vmatpush.msra.mxu2 %v946_v54  ;;  %v944_v57 = vld [vmem:[#allocation10 + $0x28] sm:$0xff] }
 0x37a   :  { %1317 = vmatpush.msra.mxu1 %v1750_v58  ;;  %965 = vmatpush.msra.mxu2 %v945_v55  ;;  %v943_v58 = vld [vmem:[#allocation10 + $0x20] sm:$0xff] }
 0x37c   :  { %1318 = vmatpush.msra.mxu1 %v1760_v61  ;;  %966 = vmatpush.msra.mxu2 %v944_v57  ;;  %v941_v61 = vld [vmem:[#allocation10 + $0x10] sm:$0xff] }
 0x37d   :  { %1291 = vmatmul.msk.bf16.gmra.mxu1 %vm651_vm0, %v1758_v59  ;;  %v942_v59 = vld [vmem:[#allocation10 + $0x18] sm:$0xff] }
 0x37e   :  { %967 = vmatpush.msra.mxu2 %v943_v58 }
 0x380   :  { %968 = vmatpush.msra.mxu2 %v942_v59 }
 0x382   :  { %969 = vmatpush.msra.mxu2 %v941_v61  ;;  %v195_v61 = vld [vmem:[#allocation8 + $0x1e8] sm:$0xff] }
 0x383   :  { %1182 = vmatpush.msra.mxu3 %v195_v61 }
 0x384   :  { %970 = vmatpush.msra.mxu2 %v940_v23  ;;  %v187_v23 = vld [vmem:[#allocation8 + $0x1a8] sm:$0xff] }
 0x386   :  { %971 = vmatpush.msra.mxu2 %v939_v5 }
 0x38d   :  { %1115 = vmatmul.f32.vlgmr.msra.gmra.mxu1 %v1089_v35 }
 0x3a4   :  { %v1107_v19 = vpop.f32.mrf.mxu0 }
 0x3a5   :  { %v1292_v34 = vclamps-f32 %v1107_v19, 5.0  ;;  %v167_v19 = vld [vmem:[#allocation8 + $0x108] sm:$0xff] }
 0x3a7   :  { %v1127_v44 = vmul.f32 1.442695, %v1292_v34 }
 0x3ac   :  { %v1110_v50 = vpop.f32.mrf.mxu0 }
 0x3ad   :  { %v1293_v27 = vclamps-f32 %v1110_v50, 5.0  ;;  %v159_v50 = vld [vmem:[#allocation8 + $0xc8] sm:$0xff] }
 0x3af   :  { %v1129_v40 = vmul.f32 1.442695, %v1293_v27 }
 0x3b4   :  { %v1113_v12 = vpop.f32.mrf.mxu0 }
 0x3b5   :  { %v1294_v24 = vclamps-f32 %v1113_v12, 5.0 }
 0x3b7   :  { %v1131_v32 = vmul.f32 1.442695, %v1294_v24  ;;  %v151_v24 = vld [vmem:[#allocation8 + $0x88] sm:$0xff] }
 0x3b9   :  { %1351 = vpow2.f32 %v1131_v32  ;;  %v147_v32 = vld [vmem:[#allocation8 + $0x68] sm:$0xff] }
 0x3bf   :  { %v1352_v45 = vpop.eup %1351 }
 0x3da   :  { %v931_v9 = vpop.f32.mrf.mxu1 }
 0x3db   :  { %v932_v15 = vadd.f32 %v931_v9, %v913_v7 }
 0x3dd   :  { %v937_v16 = vmax.f32 %v932_v15, 0.0  ;;  %v179_v15 = vld [vmem:[#allocation8 + $0x168] sm:$0xff] }
 0x3df   :  { %972 = vmatmul.f32.vlgmr.msra.gmra.mxu2 %v937_v16 }
 0x3e2   :  { %v934_v17 = vpop.f32.mrf.mxu1 }
 0x3e3   :  { %v935_v37 = vadd.f32 %v934_v17, %v913_v7  ;;  %v183_v7 = vld [vmem:[#allocation8 + $0x188] sm:$0xff] }
 0x3e4   :  { %v175_v17 = vld [vmem:[#allocation8 + $0x148] sm:$0xff] }
 0x3e5   :  { %v938_v10 = vmax.f32 %v935_v37, 0.0 }
 0x3e7   :  { %975 = vmatmul.f32.gmra.mxu2 %v938_v10  ;;  %v171_v10 = vld [vmem:[#allocation8 + $0x128] sm:$0xff] }
 0x3ea   :  { %v1072_v18 = vpop.f32.mrf.mxu1 }
 0x3f2   :  { %v1074_v20 = vpop.f32.mrf.mxu1 }
 0x3fa   :  { %v1077_v21 = vpop.f32.mrf.mxu1 }
 0x3fb   :  { %v1137_v47 = vmul.f32 %v1352_v45, %v1077_v21 }
 0x402   :  { %v1079_v22 = vpop.f32.mrf.mxu1 }
 0x40a   :  { %v1116_v33 = vpop.f32.mrf.mxu1 }
 0x40b   :  { %v1295_v36 = vclamps-f32 %v1116_v33, 5.0  ;;  %v143_v33 = vld [vmem:[#allocation8 + $0x48] sm:$0xff] }
 0x40d   :  { %v1133_v41 = vmul.f32 1.442695, %v1295_v36  ;;  %v139_v36 = vld [vmem:[#allocation8 + $0x28] sm:$0xff] }
 0x40f   :  { %1353 = vpow2.f32 %v1133_v41 }
 0x410   :  { %1355 = vpow2.f32 %v1129_v40 }
 0x411   :  { %1357 = vpow2.f32 %v1127_v44  ;;  %v1014_v44 = vperm.slane %v1822_v39, 5 }
 0x415   :  { %v1354_v13 = vpop.eup %1353 }
 0x416   :  { %v1138_v60 = vmul.f32 %v1354_v13, %v1079_v22  ;;  %v1356_v62 = vpop.eup %1355  ;;  %v1156_v1 = vpack.c.bf16 %v1354_v13, %v1352_v45  ;;  %v155_v22 = vld [vmem:[#allocation8 + $0xa8] sm:$0xff] }
 0x417   :  { %v1136_v0 = vmul.f32 %v1356_v62, %v1074_v20  ;;  %v1358_v56 = vpop.eup %1357  ;;  %v163_v20 = vld [vmem:[#allocation8 + $0xe8] sm:$0xff] }
 0x418   :  { %v1140_v42 = vpack.c.bf16 %v1138_v60, %v1137_v47  ;;  %v1135_v63 = vmul.f32 %v1358_v56, %v1072_v18  ;;  %v1155_v2 = vpack.c.bf16 %v1356_v62, %v1358_v56  ;;  %v135_v45 = vld [vmem:[#allocation8 + $0x8] sm:$0xff]  ;;  %v1017_v62 = vperm.slane %v1822_v39, 6 }
 0x41a   :  { %1147 = vmatpush.bf16.msrb.mxu2 %v1140_v42  ;;  %v1139_v14 = vpack.c.bf16 %v1136_v0, %v1135_v63 }
 0x41e   :  { %1148 = vmatpush.bf16.msrb.mxu2 %v1139_v14 }
 0x421   :  { %1296 = vmatmul.msk.bf16.vlgmr.msrb.gmra.mxu2 %vm797_vm1, %v1785_v6 }
 0x422   :  { %1163 = vmatpush.bf16.msra.mxu2 %v1156_v1 }
 0x426   :  { %1164 = vmatpush.bf16.msra.mxu2 %v1155_v2 }
 0x431   :  { %1297 = vmatmul.msk.bf16.vlgmr.msra.gmra.mxu2 %vm797_vm1, %v1785_v6 }
 0x462   :  { %v973_v3 = vpop.f32.mrf.mxu2 }
 0x463   :  { %v974_v8 = vadd.f32 %v973_v3, %v955_v11 }
 0x465   :  { %v979_v30 = vadd.f32 %v974_v8, %v1836_v4 }
 0x46a   :  { %v976_v25 = vpop.f32.mrf.mxu2 }
 0x46b   :  { %v977_v29 = vadd.f32 %v976_v25, %v955_v11 }
 0x46d   :  { %v980_v31 = vadd.f32 %v977_v29, %v1842_v28  ;;  %v191_v28 = vld [vmem:[#allocation8 + $0x1c8] sm:$0xff] }
 0x46e   :  { %1183 = vmatpush.msra.mxu3 %v191_v28 }
 0x46f   :  { %v981_v35 = vadd.f32 %v980_v31, %v979_v30 }
 0x470   :  { %1184 = vmatpush.msra.mxu3 %v187_v23 }
 0x471   :  { %v982_v38 = vrot.slane %v981_v35, 4 }
 0x472   :  { %1185 = vmatpush.msra.mxu3 %v183_v7 }
 0x473   :  { %v983_v43 = vadd.f32 %v982_v38, %v981_v35 }
 0x474   :  { %1186 = vmatpush.msra.mxu3 %v179_v15 }
 0x475   :  { %v984_v46 = vrot.slane %v983_v43, 2 }
 0x476   :  { %1187 = vmatpush.msra.mxu3 %v175_v17 }
 0x477   :  { %v985_v48 = vadd.f32 %v984_v46, %v983_v43 }
 0x478   :  { %1188 = vmatpush.msra.mxu3 %v171_v10 }
 0x479   :  { %v986_v49 = vrot.slane %v985_v48, 1 }
 0x47a   :  { %1189 = vmatpush.msra.mxu3 %v167_v19 }
 0x47b   :  { %v987_v51 = vadd.f32 %v986_v49, %v985_v48  ;;  %v1181_v49 = vperm.slane %v1822_v39, 7 }
 0x47c   :  { %1190 = vmatpush.msra.mxu3 %v163_v20 }
 0x47d   :  { %v988_v52 = vmul.f32 %v987_v51, %v1829_v26 }
 0x47e   :  { %1191 = vmatpush.msra.mxu3 %v159_v50 }
 0x47f   :  { %v989_v6 = vsub.f32 %v979_v30, %v988_v52  ;;  %v990_v53 = vsub.f32 %v980_v31, %v988_v52 }
 0x480   :  { %1192 = vmatpush.msra.mxu3 %v155_v22 }
 0x481   :  { %v991_v54 = vmul.f32 %v989_v6, %v989_v6  ;;  %v992_v55 = vmul.f32 %v990_v53, %v990_v53 }
 0x482   :  { %1193 = vmatpush.msra.mxu3 %v151_v24 }
 0x483   :  { %v993_v57 = vadd.f32 %v992_v55, %v991_v54  ;;  %v1370_v55 = vld [vmem:[%s1894_s0 + $0x8] sm:$0xff] }
 0x484   :  { %1194 = vmatpush.msra.mxu3 %v147_v32 }
 0x485   :  { %v994_v58 = vrot.slane %v993_v57, 4 }
 0x486   :  { %1195 = vmatpush.msra.mxu3 %v143_v33 }
 0x487   :  { %v995_v59 = vadd.f32 %v994_v58, %v993_v57  ;;  %v1371_v58 = vld [vmem:[%s1894_s0 + $0x18] sm:$0xff] }
 0x488   :  { %1196 = vmatpush.msra.mxu3 %v139_v36 }
 0x489   :  { %v996_v4 = vrot.slane %v995_v59, 2 }
 0x48a   :  { %1197 = vmatpush.msra.mxu3 %v135_v45 }
 0x48b   :  { %v997_v5 = vadd.f32 %v996_v4, %v995_v59 }
 0x48d   :  { %v998_v9 = vrot.slane %v997_v5, 1 }
 0x48f   :  { %v999_v16 = vadd.f32 %v998_v9, %v997_v5 }
 0x491   :  { %v1000_v37 = vmul.f32 %v999_v16, %v1829_v26 }
 0x493   :  { %v1001_v18 = vadd.f32 1e-05, %v1000_v37 }
 0x495   :  { %1359 = vrsqrt.f32 %v1001_v18  ;;  %vm1008_vm7 = vweird.f32 %v1001_v18 }
 0x49b   :  { %v1360_v21 = vpop.eup %1359 }
 0x49c   :  { %v1003_v12 = vmul.f32 %v1360_v21, %v1001_v18  ;;  %vm1009_vm6 = vweird.f32 %v1360_v21 }
 0x49d   :  { %vm1010_vm8 = vmor %vm1008_vm7, %vm1009_vm6 }
 0x49e   :  { %v1004_v27 = vmul.f32 %v1360_v21, %v1003_v12 }
 0x4a0   :  { %v1005_v26 = vmul.f32 0.5, %v1004_v27 }
 0x4a2   :  { %v1006_v34 = vsub.f32 1.5, %v1005_v26 }
 0x4a4   :  { %v1007_v40 = vmul.f32 %v1360_v21, %v1006_v34  ;;  %v1150_v41 = vpop.f32.mrf.mxu2 }
 0x4a6   :  { %v1011_v13 = vsel %vm1010_vm8, %v1360_v21, %v1007_v40 }
 0x4a7   :  { %v1012_v47 = vmul.f32 %v1011_v13, %v989_v6  ;;  %v1013_v60 = vmul.f32 %v1011_v13, %v990_v53 }
 0x4a9   :  { %v1016_v0 = vmul.f32 %v1014_v44, %v1013_v60  ;;  %v1015_v42 = vmul.f32 %v1014_v44, %v1012_v47 }
 0x4ab   :  { %v1018_v56 = vadd.f32 %v1017_v62, %v1015_v42  ;;  %v1019_v63 = vadd.f32 %v1017_v62, %v1016_v0 }
 0x4ac   :  { %v1152_v14 = vpop.f32.mrf.mxu2 }
 0x4ad   :  { %1020 = vst [vmem:[#allocation11] sm:$0xff] %v1018_v56 }
 0x4ae   :  { %1021 = vst [vmem:[#allocation11 + $0x8] sm:$0xff] %v1019_v63 }
 0x4af   :  { %1223 = dma.vmem_to_hbm [thread:$0]  %s1216_s7, 256, %s1218_s21, [#allocation4], %s1557_s13, %s1557_s13, %s1558_s14  }
 0x4b4   :  { %v1166_v1 = vpop.f32.mrf.mxu2 }
 0x4b5   :  { %v1167_v2 = vadd.f32 1e-06, %v1166_v1 }
 0x4b7   :  { %1361 = vrcp.f32 %v1167_v2 }
 0x4bc   :  { %v1168_v3 = vpop.f32.mrf.mxu2 }
 0x4bd   :  { %v1362_v11 = vpop.eup %1361  ;;  %v1169_v8 = vadd.f32 1e-06, %v1168_v3 }
 0x4be   :  { %v1173_v25 = vmul.f32 %v1362_v11, %v1167_v2 }
 0x4bf   :  { %1363 = vrcp.f32 %v1169_v8 }
 0x4c0   :  { %v1175_v29 = vsub.f32 2.0, %v1173_v25 }
 0x4c2   :  { %v1177_v30 = vmul.f32 %v1362_v11, %v1175_v29 }
 0x4c4   :  { %v1179_v31 = vmul.f32 %v1177_v30, %v1150_v41 }
 0x4c5   :  { %v1364_v35 = vpop.eup %1363 }
 0x4c6   :  { %v1174_v38 = vmul.f32 %v1364_v35, %v1169_v8  ;;  %1198 = vmatmul.f32.vlgmr.msra.gmra.mxu3 %v1179_v31 }
 0x4c8   :  { %v1176_v43 = vsub.f32 2.0, %v1174_v38 }
 0x4ca   :  { %v1178_v46 = vmul.f32 %v1364_v35, %v1176_v43 }
 0x4cc   :  { %v1180_v48 = vmul.f32 %v1178_v46, %v1152_v14 }
 0x4ce   :  { %1201 = vmatmul.f32.gmra.mxu3 %v1180_v48 }
 0x549   :  { %v1199_v51 = vpop.f32.mrf.mxu3 }
 0x54a   :  { %v1200_v52 = vadd.f32 %v1199_v51, %v1181_v49 }
 0x54c   :  { %1365 = vtanh.f32 %v1200_v52 }
 0x551   :  { %v1202_v6 = vpop.f32.mrf.mxu3 }
 0x552   :  { %v1366_v53 = vpop.eup %1365  ;;  %v1203_v54 = vadd.f32 %v1202_v6, %v1181_v49 }
 0x553   :  { %v1207_v57 = vadd.f32 %v1370_v55, %v1366_v53 }
 0x554   :  { %1367 = vtanh.f32 %v1203_v54 }
 0x555   :  { %1209 = vst [vmem:[#allocation12] sm:$0xff] %v1207_v57 }
 0x55a   :  { %v1368_v39 = vpop.eup %1367 }
 0x55b   :  { %v1208_v59 = vadd.f32 %v1371_v58, %v1368_v39 }
 0x55d   :  { %1210 = vst [vmem:[#allocation12 + $0x8] sm:$0xff] %v1208_v59 }
 0x55e   :  { %1236 = dma.vmem_to_hbm [thread:$0]  %s1229_s24, 256, %s1231_s4, [#allocation13], %s1557_s13, %s1557_s13, %s1558_s14  }
 0x55f   :  { %1546 = dma.done.wait [#allocation4], 256  }
 0x560   :  { %1547 = vsyncadd [#allocation4], 4294967040 }
 0x561   :  { %1548 = dma.done.wait [#allocation13], 256  }
 0x562   :  { %1549 = vsyncadd [#allocation13], 4294967040 }
 0x563   :  { %1245 = vsyncpa [#allocation3], 1 }
 0x564   :  { %1246 = vsyncpa [#allocation6], 1 }
 0x565   :  { %1247 = vsyncpa [#allocation9], 1 }
 0x566   :  { %1248 = vsyncpa [#allocation4], 1 }
 0x567   :  { %1249 = vsyncpa [#allocation13], 1 }

</bundles_post_ra>
